<compile_context>
chip_gen: v6e
topology: v6e:2x2x1
jax: 0.10.0
libtpu: 0.0.40
codegen_flags: <defaults>
</compile_context>

<pallas_src>
import functools

import jax
import jax.numpy as jnp
from jax.experimental import pallas as pl
from jax.experimental.pallas import tpu as pltpu


def _round_up(x, m):
    return (x + m - 1) // m * m


def _apply_activation(x, activation):
    if activation is None:
        return x
    if activation == 'relu':
        return jnp.maximum(x, 0.0)
    if activation == 'lrelu':
        return jnp.where(x > 0.0, x, 0.1 * x)
    if activation == 'elu':
        return jnp.where(x > 0.0, x, jnp.expm1(x))
    raise ValueError('only "relu/elu/lrelu" allowed')


def _vmem_limit_bytes():
    """Per-generation VMEM budget: ~3/4 of physical, capped at 100 MiB.

    v5e/v6e (128 MiB physical) -> 96 MiB; v7x (64 MiB) -> 48 MiB.
    """
    try:
        cap = int(pltpu.get_tpu_info().vmem_capacity_bytes)
        return int(min(cap * 3 // 4, 100 * 1024 * 1024))
    except Exception:
        return 48 * 1024 * 1024


# ---------------------------------------------------------------------------
# Kernels
# ---------------------------------------------------------------------------
def _conv_accumulate(x_ref, w_ref, *, KH, KW, OH, OW, stride, ocp):
    """In-kernel im2col: KH*KW shifted taps of the VMEM-resident padded image,
    each contracted over Cin on the MXU, accumulated in f32.

    x_ref: (Hp, Wp, Cp) zero-padded NHWC image (one batch element).
    w_ref: (KH*KW, Cp, OCp) weights, tap-major.
    """
    acc = jnp.zeros((OH * OW, ocp), jnp.float32)
    for kh in range(KH):                         # static unroll: KH*KW small dots
        for kw in range(KW):
            if stride == 1:
                tap = x_ref[kh:kh + OH, kw:kw + OW, :]
            else:
                tap = x_ref[pl.ds(kh, OH, stride=stride),
                            pl.ds(kw, OW, stride=stride), :]
            lhs = tap.reshape(OH * OW, tap.shape[-1])
            acc = acc + jnp.dot(lhs, w_ref[kh * KW + kw],
                                preferred_element_type=jnp.float32)
    return acc


def _conv_bias_act_kernel(x_ref, w_ref, b_ref, o_ref, *, KH, KW, OH, OW,
                          stride, activation):
    """Conv + bias + activation (no-normalization path, single fused pass)."""
    acc = _conv_accumulate(x_ref, w_ref, KH=KH, KW=KW, OH=OH, OW=OW,
                           stride=stride, ocp=o_ref.shape[-1])
    o_ref[...] = _apply_activation(acc + b_ref[...], activation).astype(o_ref.dtype)


def _conv_stats_kernel(x_ref, w_ref, y_ref, stats_ref, *, KH, KW, OH, OW, stride):
    """Conv + per-image BN partial statistics (pass 1 of the batch-norm path).

    No bias: the PyTorch module disables the conv bias whenever normalization
    is enabled.  y is stored in y_ref.dtype (bf16 fast path); statistics are
    taken from the f32 accumulator: per-image sum and *centered* sum of squared
    deviations (numerically-stable parallel-variance combine happens outside).
    """
    acc = _conv_accumulate(x_ref, w_ref, KH=KH, KW=KW, OH=OH, OW=OW,
                           stride=stride, ocp=y_ref.shape[-1])
    y_ref[...] = acc.astype(y_ref.dtype)
    s = jnp.sum(acc, axis=0, keepdims=True)                  # (1, OCp)
    mu = s * (1.0 / (OH * OW))
    d = acc - mu
    m2 = jnp.sum(d * d, axis=0, keepdims=True)               # (1, OCp) centered
    stats_ref[...] = jnp.concatenate([s, m2], axis=0)        # (2, OCp)


def _scale_shift_act_kernel(y_ref, scale_ref, shift_ref, o_ref, *, activation):
    """Pass 2: fused per-channel scale/shift (one FMA) + activation."""
    y = y_ref[...].astype(jnp.float32)
    o_ref[...] = _apply_activation(
        y * scale_ref[...] + shift_ref[...], activation).astype(o_ref.dtype)


# ---------------------------------------------------------------------------
# Wrapper (PyTorch-equivalent forward)
# ---------------------------------------------------------------------------
def conv2d_forward(x, weight, bias=None, gamma=None, beta=None, *,
                   stride=1, padding=0, activation=None, normalization=None,
                   eps=1e-3, compute_dtype=jnp.bfloat16, out_layout='NCHW'):
    """Forward of Conv2d(...) from PCNBV model_utils (train-mode norm stats).

    x:          [N, Cin, H, W]   (NCHW, like PyTorch)
    weight:     [Cout, Cin, KH, KW]
    bias:       [Cout] or None   (ignored when normalization is set, as in torch)
    gamma/beta: [Cout] affine norm params (used only when normalization is set)
    compute_dtype: dtype fed to the MXU (bf16 fast path; accumulation is f32).
    out_layout: 'NCHW' (torch-compatible) or 'NHWC' (skips the permute round trip).
    """
    N, C, H, W = x.shape
    OC, wc, KH, KW = weight.shape
    assert wc == C, "weight / input channel mismatch"
    OH = (H + 2 * padding - KH) // stride + 1
    OW = (W + 2 * padding - KW) // stride + 1
    ohw = OH * OW
    rows = N * ohw

    # Channel padding: Cin -> multiple of 8 (sublane-aligned per-tap contraction);
    # Cout -> multiple of 128 only when already >=128 (keeps small layers free of
    # 16x zero-inflated stores; the contraction dim is never padded at all).
    cp = _round_up(C, 8)
    ocp = _round_up(OC, 128) if OC >= 128 else OC

    # NHWC + early cast to the MXU compute dtype + zero padding.  The kernel does
    # its own im2col from this array; nothing KH*KW-expanded ever touches HBM.
    hp = H + 2 * padding
    wp = W + 2 * padding
    x_nhwc = jnp.transpose(x, (0, 2, 3, 1)).astype(compute_dtype)
    x_nhwc = jnp.pad(x_nhwc, ((0, 0), (padding, padding), (padding, padding),
                              (0, cp - C)))

    # Weights: (OC, Cin, KH, KW) -> (KH*KW, Cp, OCp), tap-major to match the kernel.
    w = jnp.transpose(weight, (2, 3, 1, 0)).reshape(KH * KW, C, OC)
    w = jnp.pad(w, ((0, 0), (0, cp - C), (0, ocp - OC))).astype(compute_dtype)

    # --- specs: one padded image per grid step; weights / per-channel vectors
    #     stay VMEM-resident (constant block index across the batch axis). -----
    x_spec = pl.BlockSpec((None, hp, wp, cp), lambda n: (n, 0, 0, 0))
    w_spec = pl.BlockSpec((KH * KW, cp, ocp), lambda n: (0, 0, 0))
    vec_spec = pl.BlockSpec((1, ocp), lambda n: (0, 0))
    y_spec = pl.BlockSpec((None, ohw, ocp), lambda n: (n, 0, 0))

    cparams = pltpu.CompilerParams(
        dimension_semantics=("parallel",),          # images are independent
        vmem_limit_bytes=_vmem_limit_bytes())       # per-generation budget

    itemsize = jnp.dtype(compute_dtype).itemsize
    conv_cost = pl.CostEstimate(
        flops=int(2 * rows * cp * KH * KW * ocp),
        transcendentals=0,
        bytes_accessed=int((N * hp * wp * cp + KH * KW * cp * ocp) * itemsize
                           + rows * ocp * itemsize))

    kern_kw = dict(KH=KH, KW=KW, OH=OH, OW=OW, stride=stride)

    if normalization is None:
        b = (bias.astype(jnp.float32) if bias is not None
             else jnp.zeros((OC,), jnp.float32))
        b = jnp.pad(b, (0, ocp - OC)).reshape(1, ocp)
        out = pl.pallas_call(
            functools.partial(_conv_bias_act_kernel, activation=activation,
                              **kern_kw),
            out_shape=jax.ShapeDtypeStruct((N, ohw, ocp), x.dtype),
            grid=(N,),
            in_specs=[x_spec, w_spec, vec_spec],
            out_specs=y_spec,
            compiler_params=cparams,
            cost_estimate=conv_cost,
        )(x_nhwc, w, b)

    elif normalization == 'batch':
        # Pass 1: conv + per-image (sum, centered sum-of-squares) per channel.
        # y intermediate is stored in compute_dtype (bf16 on the fast path);
        # statistics are taken from the f32 accumulator inside the kernel.
        y, stats = pl.pallas_call(
            functools.partial(_conv_stats_kernel, **kern_kw),
            out_shape=(jax.ShapeDtypeStruct((N, ohw, ocp), compute_dtype),
                       jax.ShapeDtypeStruct((N, 2, ocp), jnp.float32)),
            grid=(N,),
            in_specs=[x_spec, w_spec],
            out_specs=(y_spec, pl.BlockSpec((None, 2, ocp), lambda n: (n, 0, 0))),
            compiler_params=cparams,
            cost_estimate=conv_cost,
        )(x_nhwc, w)

        # Tiny cross-image reduction (numerically-stable parallel-variance
        # combine), folded with the affine params into one per-channel
        # scale & shift.  There are no padded rows, so dividing by `rows` is exact.
        g = gamma if gamma is not None else jnp.ones((OC,), jnp.float32)
        bt = beta if beta is not None else jnp.zeros((OC,), jnp.float32)
        g = jnp.pad(g.astype(jnp.float32), (0, ocp - OC), constant_values=1.0)
        bt = jnp.pad(bt.astype(jnp.float32), (0, ocp - OC))
        s = stats[:, 0, :]                          # (N, ocp) per-image sums
        m2 = stats[:, 1, :]                         # (N, ocp) centered SS per image
        mean_img = s / ohw
        mean = jnp.sum(s, axis=0) / rows
        var = (jnp.sum(m2, axis=0)
               + ohw * jnp.sum((mean_img - mean) ** 2, axis=0)) / rows
        scale = g * jax.lax.rsqrt(var + eps)        # eps=1e-3 matches the module
        shift = bt - mean * scale

        # Pass 2: fused per-channel scale/shift (one FMA) + activation, writing
        # the output directly in x.dtype; alias y into the output when possible.
        alias = ({0: 0} if jnp.dtype(compute_dtype) == jnp.dtype(x.dtype) else {})
        out = pl.pallas_call(
            functools.partial(_scale_shift_act_kernel, activation=activation),
            out_shape=jax.ShapeDtypeStruct((N, ohw, ocp), x.dtype),
            grid=(N,),
            in_specs=[y_spec, vec_spec, vec_spec],
            out_specs=y_spec,
            compiler_params=cparams,
            input_output_aliases=alias,
        )(y, scale.reshape(1, ocp), shift.reshape(1, ocp))

    elif normalization == 'instance':
        # TODO(synk): instance normalization needs per-(sample, channel) spatial
        #             stats; not implemented in this kernel set.
        raise NotImplementedError("instance normalization not implemented")
    else:
        raise ValueError('only "batch/instance" normalization permitted.')

    # --- unpad (only the Cout lane padding, if any) and lay out the result. ----
    out = out[:, :, :OC].reshape(N, OH, OW, OC)
    if out_layout == 'NHWC':
        return out
    return jnp.transpose(out, (0, 3, 1, 2))         # torch-compatible NCHW


# ---------------------------------------------------------------------------
# Pure-JAX reference mirroring the PyTorch module forward (train-mode BN)
# ---------------------------------------------------------------------------
def _reference(x, weight, bias, gamma, beta, *, stride, padding,
               activation, normalization, eps=1e-3):
    y = jax.lax.conv_general_dilated(
        x, weight, (stride, stride), [(padding, padding)] * 2,
        dimension_numbers=('NCHW', 'OIHW', 'NCHW'))
    if normalization is None and bias is not None:
        y = y + bias.reshape(1, -1, 1, 1)
    if normalization == 'batch':
        mean = y.mean(axis=(0, 2, 3), keepdims=True)
        var = ((y - mean) ** 2).mean(axis=(0, 2, 3), keepdims=True)
        y = (y - mean) * jax.lax.rsqrt(var + eps)
        y = y * gamma.reshape(1, -1, 1, 1) + beta.reshape(1, -1, 1, 1)
    if activation == 'relu':
        y = jnp.maximum(y, 0.0)
    elif activation == 'lrelu':
        y = jnp.where(y > 0.0, y, 0.1 * y)
    elif activation == 'elu':
        y = jnp.where(y > 0.0, y, jnp.expm1(y))
    return y


if __name__ == "__main__":
    key = jax.random.PRNGKey(0)
    k_x, k_w, k_b, k_g, k_beta = jax.random.split(key, 5)

    # Module config: Conv2d(4, 8, 3, stride=1, padding=1, ...)
    N, Cin, H, W = 2, 4, 16, 16
    Cout, K = 8, 3
    stride, padding = 1, 1

    x = jax.random.normal(k_x, (N, Cin, H, W), jnp.float32)
    fan_in = Cin * K * K
    weight = jax.random.normal(k_w, (Cout, Cin, K, K), jnp.float32) / jnp.sqrt(fan_in)
    bias = jax.random.normal(k_b, (Cout,), jnp.float32) * 0.1
    gamma = 1.0 + 0.1 * jax.random.normal(k_g, (Cout,), jnp.float32)
    beta = 0.1 * jax.random.normal(k_beta, (Cout,), jnp.float32)

    # 1) batch-norm + relu, exact f32 MXU path (exercises the cross-image
    #    two-pass BN reduction and pass-2 output aliasing).
    y = conv2d_forward(x, weight, bias, gamma, beta,
                       stride=stride, padding=padding,
                       activation='relu', normalization='batch',
                       compute_dtype=jnp.float32)
    y = jax.block_until_ready(y)
    y_ref = _reference(x, weight, bias, gamma, beta,
                       stride=stride, padding=padding,
                       activation='relu', normalization='batch')
    assert y.shape == (N, Cout, H, W), y.shape
    assert y.dtype == x.dtype, y.dtype
    assert jnp.allclose(y, y_ref, atol=1e-4, rtol=1e-4), float(jnp.abs(y - y_ref).max())

    # 2) same config on the bf16 fast path (bf16 MXU inputs + bf16 y intermediate).
    y16 = conv2d_forward(x, weight, bias, gamma, beta,
                         stride=stride, padding=padding,
                         activation='relu', normalization='batch',
                         compute_dtype=jnp.bfloat16)
    y16 = jax.block_until_ready(y16)
    assert jnp.allclose(y16, y_ref, atol=3e-2, rtol=3e-2), float(jnp.abs(y16 - y_ref).max())

    # 3) bias + leaky-relu, no normalization (single fused kernel pass).
    y2 = conv2d_forward(x, weight, bias, None, None,
                        stride=stride, padding=padding,
                        activation='lrelu', normalization=None,
                        compute_dtype=jnp.float32)
    y2 = jax.block_until_ready(y2)
    y2_ref = _reference(x, weight, bias, None, None,
                        stride=stride, padding=padding,
                        activation='lrelu', normalization=None)
    assert jnp.allclose(y2, y2_ref, atol=1e-4, rtol=1e-4), float(jnp.abs(y2 - y2_ref).max())

    print("KERNEL_OK")
</pallas_src>

<mosaic_0001>
module attributes {stable_mosaic.version = 11 : i64} {
  func.func @_conv_stats_kernel(%arg0: i32, %arg1: memref<1x18x18x8xf32, #tpu.memory_space<vmem>>, %arg2: memref<9x8x8xf32, #tpu.memory_space<vmem>>, %arg3: memref<1x256x8xf32, #tpu.memory_space<vmem>>, %arg4: memref<1x2x8xf32, #tpu.memory_space<vmem>>) attributes {dimension_semantics = [#tpu.dimension_semantics<parallel>], iteration_bounds = array<i64: 2>, scalar_prefetch = 0 : i64, scratch_operands = 0 : i64, tpu.core_type = #tpu.core_type<tc>, window_params = [{transform_indices = @transform_0, window_bounds = array<i64: 1, 18, 18, 8>}, {pipeline_mode = #tpu.pipeline_mode<synchronous>, transform_indices = @transform_1, window_bounds = array<i64: 9, 8, 8>}, {transform_indices = @transform_2, window_bounds = array<i64: 1, 256, 8>}, {transform_indices = @transform_3, window_bounds = array<i64: 1, 2, 8>}]} {
    %cst = arith.constant 0.000000e+00 : f32
    %0 = vector.broadcast %cst : f32 to vector<256x8xf32>
    %c0 = arith.constant 0 : index
    %c0_0 = arith.constant 0 : index
    %c0_1 = arith.constant 0 : index
    %c0_2 = arith.constant 0 : index
    %1 = vector.load %arg1[%c0, %c0_0, %c0_1, %c0_2] : memref<1x18x18x8xf32, #tpu.memory_space<vmem>>, vector<1x16x16x8xf32>
    %2 = vector.shape_cast %1 : vector<1x16x16x8xf32> to vector<16x16x8xf32>
    %3 = vector.shape_cast %2 : vector<16x16x8xf32> to vector<256x8xf32>
    %c0_3 = arith.constant 0 : index
    %c0_4 = arith.constant 0 : index
    %c0_5 = arith.constant 0 : index
    %4 = vector.load %arg2[%c0_3, %c0_4, %c0_5] : memref<9x8x8xf32, #tpu.memory_space<vmem>>, vector<1x8x8xf32>
    %5 = vector.shape_cast %4 : vector<1x8x8xf32> to vector<8x8xf32>
    %cst_6 = arith.constant dense<0.000000e+00> : vector<256x8xf32>
    %6 = tpu.matmul %3, %5, %cst_6 {dimension_numbers = #tpu.dot_dimension_numbers<[1], [0], [0], [1], [0, 0, 1, 1], [], []>} : vector<256x8xf32>, vector<8x8xf32>, vector<256x8xf32> -> vector<256x8xf32>
    %7 = arith.addf %0, %6 : vector<256x8xf32>
    %c0_7 = arith.constant 0 : index
    %c0_8 = arith.constant 0 : index
    %c1 = arith.constant 1 : index
    %c0_9 = arith.constant 0 : index
    %8 = vector.load %arg1[%c0_7, %c0_8, %c1, %c0_9] : memref<1x18x18x8xf32, #tpu.memory_space<vmem>>, vector<1x16x16x8xf32>
    %9 = vector.shape_cast %8 : vector<1x16x16x8xf32> to vector<16x16x8xf32>
    %10 = vector.shape_cast %9 : vector<16x16x8xf32> to vector<256x8xf32>
    %c1_10 = arith.constant 1 : index
    %c0_11 = arith.constant 0 : index
    %c0_12 = arith.constant 0 : index
    %11 = vector.load %arg2[%c1_10, %c0_11, %c0_12] : memref<9x8x8xf32, #tpu.memory_space<vmem>>, vector<1x8x8xf32>
    %12 = vector.shape_cast %11 : vector<1x8x8xf32> to vector<8x8xf32>
    %cst_13 = arith.constant dense<0.000000e+00> : vector<256x8xf32>
    %13 = tpu.matmul %10, %12, %cst_13 {dimension_numbers = #tpu.dot_dimension_numbers<[1], [0], [0], [1], [0, 0, 1, 1], [], []>} : vector<256x8xf32>, vector<8x8xf32>, vector<256x8xf32> -> vector<256x8xf32>
    %14 = arith.addf %7, %13 : vector<256x8xf32>
    %c0_14 = arith.constant 0 : index
    %c0_15 = arith.constant 0 : index
    %c2 = arith.constant 2 : index
    %c0_16 = arith.constant 0 : index
    %15 = vector.load %arg1[%c0_14, %c0_15, %c2, %c0_16] : memref<1x18x18x8xf32, #tpu.memory_space<vmem>>, vector<1x16x16x8xf32>
    %16 = vector.shape_cast %15 : vector<1x16x16x8xf32> to vector<16x16x8xf32>
    %17 = vector.shape_cast %16 : vector<16x16x8xf32> to vector<256x8xf32>
    %c2_17 = arith.constant 2 : index
    %c0_18 = arith.constant 0 : index
    %c0_19 = arith.constant 0 : index
    %18 = vector.load %arg2[%c2_17, %c0_18, %c0_19] : memref<9x8x8xf32, #tpu.memory_space<vmem>>, vector<1x8x8xf32>
    %19 = vector.shape_cast %18 : vector<1x8x8xf32> to vector<8x8xf32>
    %cst_20 = arith.constant dense<0.000000e+00> : vector<256x8xf32>
    %20 = tpu.matmul %17, %19, %cst_20 {dimension_numbers = #tpu.dot_dimension_numbers<[1], [0], [0], [1], [0, 0, 1, 1], [], []>} : vector<256x8xf32>, vector<8x8xf32>, vector<256x8xf32> -> vector<256x8xf32>
    %21 = arith.addf %14, %20 : vector<256x8xf32>
    %c0_21 = arith.constant 0 : index
    %c1_22 = arith.constant 1 : index
    %c0_23 = arith.constant 0 : index
    %c0_24 = arith.constant 0 : index
    %22 = vector.load %arg1[%c0_21, %c1_22, %c0_23, %c0_24] : memref<1x18x18x8xf32, #tpu.memory_space<vmem>>, vector<1x16x16x8xf32>
    %23 = vector.shape_cast %22 : vector<1x16x16x8xf32> to vector<16x16x8xf32>
    %24 = vector.shape_cast %23 : vector<16x16x8xf32> to vector<256x8xf32>
    %c3 = arith.constant 3 : index
    %c0_25 = arith.constant 0 : index
    %c0_26 = arith.constant 0 : index
    %25 = vector.load %arg2[%c3, %c0_25, %c0_26] : memref<9x8x8xf32, #tpu.memory_space<vmem>>, vector<1x8x8xf32>
    %26 = vector.shape_cast %25 : vector<1x8x8xf32> to vector<8x8xf32>
    %cst_27 = arith.constant dense<0.000000e+00> : vector<256x8xf32>
    %27 = tpu.matmul %24, %26, %cst_27 {dimension_numbers = #tpu.dot_dimension_numbers<[1], [0], [0], [1], [0, 0, 1, 1], [], []>} : vector<256x8xf32>, vector<8x8xf32>, vector<256x8xf32> -> vector<256x8xf32>
    %28 = arith.addf %21, %27 : vector<256x8xf32>
    %c0_28 = arith.constant 0 : index
    %c1_29 = arith.constant 1 : index
    %c1_30 = arith.constant 1 : index
    %c0_31 = arith.constant 0 : index
    %29 = vector.load %arg1[%c0_28, %c1_29, %c1_30, %c0_31] : memref<1x18x18x8xf32, #tpu.memory_space<vmem>>, vector<1x16x16x8xf32>
    %30 = vector.shape_cast %29 : vector<1x16x16x8xf32> to vector<16x16x8xf32>
    %31 = vector.shape_cast %30 : vector<16x16x8xf32> to vector<256x8xf32>
    %c4 = arith.constant 4 : index
    %c0_32 = arith.constant 0 : index
    %c0_33 = arith.constant 0 : index
    %32 = vector.load %arg2[%c4, %c0_32, %c0_33] : memref<9x8x8xf32, #tpu.memory_space<vmem>>, vector<1x8x8xf32>
    %33 = vector.shape_cast %32 : vector<1x8x8xf32> to vector<8x8xf32>
    %cst_34 = arith.constant dense<0.000000e+00> : vector<256x8xf32>
    %34 = tpu.matmul %31, %33, %cst_34 {dimension_numbers = #tpu.dot_dimension_numbers<[1], [0], [0], [1], [0, 0, 1, 1], [], []>} : vector<256x8xf32>, vector<8x8xf32>, vector<256x8xf32> -> vector<256x8xf32>
    %35 = arith.addf %28, %34 : vector<256x8xf32>
    %c0_35 = arith.constant 0 : index
    %c1_36 = arith.constant 1 : index
    %c2_37 = arith.constant 2 : index
    %c0_38 = arith.constant 0 : index
    %36 = vector.load %arg1[%c0_35, %c1_36, %c2_37, %c0_38] : memref<1x18x18x8xf32, #tpu.memory_space<vmem>>, vector<1x16x16x8xf32>
    %37 = vector.shape_cast %36 : vector<1x16x16x8xf32> to vector<16x16x8xf32>
    %38 = vector.shape_cast %37 : vector<16x16x8xf32> to vector<256x8xf32>
    %c5 = arith.constant 5 : index
    %c0_39 = arith.constant 0 : index
    %c0_40 = arith.constant 0 : index
    %39 = vector.load %arg2[%c5, %c0_39, %c0_40] : memref<9x8x8xf32, #tpu.memory_space<vmem>>, vector<1x8x8xf32>
    %40 = vector.shape_cast %39 : vector<1x8x8xf32> to vector<8x8xf32>
    %cst_41 = arith.constant dense<0.000000e+00> : vector<256x8xf32>
    %41 = tpu.matmul %38, %40, %cst_41 {dimension_numbers = #tpu.dot_dimension_numbers<[1], [0], [0], [1], [0, 0, 1, 1], [], []>} : vector<256x8xf32>, vector<8x8xf32>, vector<256x8xf32> -> vector<256x8xf32>
    %42 = arith.addf %35, %41 : vector<256x8xf32>
    %c0_42 = arith.constant 0 : index
    %c2_43 = arith.constant 2 : index
    %c0_44 = arith.constant 0 : index
    %c0_45 = arith.constant 0 : index
    %43 = vector.load %arg1[%c0_42, %c2_43, %c0_44, %c0_45] : memref<1x18x18x8xf32, #tpu.memory_space<vmem>>, vector<1x16x16x8xf32>
    %44 = vector.shape_cast %43 : vector<1x16x16x8xf32> to vector<16x16x8xf32>
    %45 = vector.shape_cast %44 : vector<16x16x8xf32> to vector<256x8xf32>
    %c6 = arith.constant 6 : index
    %c0_46 = arith.constant 0 : index
    %c0_47 = arith.constant 0 : index
    %46 = vector.load %arg2[%c6, %c0_46, %c0_47] : memref<9x8x8xf32, #tpu.memory_space<vmem>>, vector<1x8x8xf32>
    %47 = vector.shape_cast %46 : vector<1x8x8xf32> to vector<8x8xf32>
    %cst_48 = arith.constant dense<0.000000e+00> : vector<256x8xf32>
    %48 = tpu.matmul %45, %47, %cst_48 {dimension_numbers = #tpu.dot_dimension_numbers<[1], [0], [0], [1], [0, 0, 1, 1], [], []>} : vector<256x8xf32>, vector<8x8xf32>, vector<256x8xf32> -> vector<256x8xf32>
    %49 = arith.addf %42, %48 : vector<256x8xf32>
    %c0_49 = arith.constant 0 : index
    %c2_50 = arith.constant 2 : index
    %c1_51 = arith.constant 1 : index
    %c0_52 = arith.constant 0 : index
    %50 = vector.load %arg1[%c0_49, %c2_50, %c1_51, %c0_52] : memref<1x18x18x8xf32, #tpu.memory_space<vmem>>, vector<1x16x16x8xf32>
    %51 = vector.shape_cast %50 : vector<1x16x16x8xf32> to vector<16x16x8xf32>
    %52 = vector.shape_cast %51 : vector<16x16x8xf32> to vector<256x8xf32>
    %c7 = arith.constant 7 : index
    %c0_53 = arith.constant 0 : index
    %c0_54 = arith.constant 0 : index
    %53 = vector.load %arg2[%c7, %c0_53, %c0_54] : memref<9x8x8xf32, #tpu.memory_space<vmem>>, vector<1x8x8xf32>
    %54 = vector.shape_cast %53 : vector<1x8x8xf32> to vector<8x8xf32>
    %cst_55 = arith.constant dense<0.000000e+00> : vector<256x8xf32>
    %55 = tpu.matmul %52, %54, %cst_55 {dimension_numbers = #tpu.dot_dimension_numbers<[1], [0], [0], [1], [0, 0, 1, 1], [], []>} : vector<256x8xf32>, vector<8x8xf32>, vector<256x8xf32> -> vector<256x8xf32>
    %56 = arith.addf %49, %55 : vector<256x8xf32>
    %c0_56 = arith.constant 0 : index
    %c2_57 = arith.constant 2 : index
    %c2_58 = arith.constant 2 : index
    %c0_59 = arith.constant 0 : index
    %57 = vector.load %arg1[%c0_56, %c2_57, %c2_58, %c0_59] : memref<1x18x18x8xf32, #tpu.memory_space<vmem>>, vector<1x16x16x8xf32>
    %58 = vector.shape_cast %57 : vector<1x16x16x8xf32> to vector<16x16x8xf32>
    %59 = vector.shape_cast %58 : vector<16x16x8xf32> to vector<256x8xf32>
    %c8 = arith.constant 8 : index
    %c0_60 = arith.constant 0 : index
    %c0_61 = arith.constant 0 : index
    %60 = vector.load %arg2[%c8, %c0_60, %c0_61] : memref<9x8x8xf32, #tpu.memory_space<vmem>>, vector<1x8x8xf32>
    %61 = vector.shape_cast %60 : vector<1x8x8xf32> to vector<8x8xf32>
    %cst_62 = arith.constant dense<0.000000e+00> : vector<256x8xf32>
    %62 = tpu.matmul %59, %61, %cst_62 {dimension_numbers = #tpu.dot_dimension_numbers<[1], [0], [0], [1], [0, 0, 1, 1], [], []>} : vector<256x8xf32>, vector<8x8xf32>, vector<256x8xf32> -> vector<256x8xf32>
    %63 = arith.addf %56, %62 : vector<256x8xf32>
    %c0_63 = arith.constant 0 : index
    %c0_64 = arith.constant 0 : index
    %c0_65 = arith.constant 0 : index
    %64 = vector.load %arg3[%c0_63, %c0_64, %c0_65] : memref<1x256x8xf32, #tpu.memory_space<vmem>>, vector<1x256x8xf32>
    %65 = vector.shape_cast %64 : vector<1x256x8xf32> to vector<256x8xf32>
    %66 = vector.shape_cast %63 : vector<256x8xf32> to vector<1x256x8xf32>
    tpu.vector_store %arg3[%c0_63, %c0_64, %c0_65], %66 {strides = array<i32>} : memref<1x256x8xf32, #tpu.memory_space<vmem>>, vector<1x256x8xf32>,
    %cst_66 = arith.constant dense<0.000000e+00> : vector<8xf32>
    %67 = vector.multi_reduction <add>, %63, %cst_66 [0] : vector<256x8xf32> to vector<8xf32>
    %68 = vector.shape_cast %67 : vector<8xf32> to vector<1x8xf32>
    %cst_67 = arith.constant 3.906250e-03 : f32
    %69 = vector.broadcast %cst_67 : f32 to vector<1x8xf32>
    %70 = arith.mulf %68, %69 : vector<1x8xf32>
    %71 = vector.broadcast %70 : vector<1x8xf32> to vector<256x8xf32>
    %72 = arith.subf %63, %71 : vector<256x8xf32>
    %73 = arith.mulf %72, %72 : vector<256x8xf32>
    %cst_68 = arith.constant dense<0.000000e+00> : vector<8xf32>
    %74 = vector.multi_reduction <add>, %73, %cst_68 [0] : vector<256x8xf32> to vector<8xf32>
    %75 = vector.shape_cast %74 : vector<8xf32> to vector<1x8xf32>
    %76 = tpu.concatenate %68, %75 in 0 : vector<1x8xf32>, vector<1x8xf32> -> vector<2x8xf32>
    %c0_69 = arith.constant 0 : index
    %c0_70 = arith.constant 0 : index
    %c0_71 = arith.constant 0 : index
    %77 = vector.load %arg4[%c0_69, %c0_70, %c0_71] : memref<1x2x8xf32, #tpu.memory_space<vmem>>, vector<1x2x8xf32>
    %78 = vector.shape_cast %77 : vector<1x2x8xf32> to vector<2x8xf32>
    %79 = vector.shape_cast %76 : vector<2x8xf32> to vector<1x2x8xf32>
    tpu.vector_store %arg4[%c0_69, %c0_70, %c0_71], %79 {strides = array<i32>} : memref<1x2x8xf32, #tpu.memory_space<vmem>>, vector<1x2x8xf32>,
    return
  }
  func.func @transform_0(%arg0: i32) -> (i32, i32, i32, i32) {
    %c0_i32 = arith.constant 0 : i32
    %c0_i32_0 = arith.constant 0 : i32
    %c0_i32_1 = arith.constant 0 : i32
    %c0_i32_2 = arith.constant 0 : i32
    return %arg0, %c0_i32, %c0_i32_0, %c0_i32_1 : i32, i32, i32, i32
  }
  func.func @transform_1(%arg0: i32) -> (i32, i32, i32) {
    %c0_i32 = arith.constant 0 : i32
    %c0_i32_0 = arith.constant 0 : i32
    %c0_i32_1 = arith.constant 0 : i32
    %c0_i32_2 = arith.constant 0 : i32
    return %c0_i32, %c0_i32_0, %c0_i32_1 : i32, i32, i32
  }
  func.func @transform_2(%arg0: i32) -> (i32, i32, i32) {
    %c0_i32 = arith.constant 0 : i32
    %c0_i32_0 = arith.constant 0 : i32
    %c0_i32_1 = arith.constant 0 : i32
    return %arg0, %c0_i32, %c0_i32_0 : i32, i32, i32
  }
  func.func @transform_3(%arg0: i32) -> (i32, i32, i32) {
    %c0_i32 = arith.constant 0 : i32
    %c0_i32_0 = arith.constant 0 : i32
    %c0_i32_1 = arith.constant 0 : i32
    return %arg0, %c0_i32, %c0_i32_0 : i32, i32, i32
  }
}

</mosaic_0001>

<bundles_post_ra>
// kernel: tpu_custom_call.1
= control target key start
LH: loop header
LB: loop body
LE: loop exit
PB: predicated region body
PF: predicated region fallthrough
CT: control target
= control target key end

     0   :  { %9 = vsyncpa [#allocation3], 0  ;;  %s7140_s0 = inlined_call_operand.vmem [shape: f32[2,18,18,8], index: 0, kind: input, shape index: {}]   ;;  %s7141_s1 = inlined_call_operand.vmem [shape: f32[9,8,8], index: 1, kind: input, shape index: {}]   ;;  %s7142_s2 = inlined_call_operand.vmem [shape: f32[2,256,8], index: 2, kind: output, shape index: {0}]   ;;  %s7143_s3 = inlined_call_operand.hbm [shape: f32[2,2,8], index: 3, kind: output, shape index: {1}]  }
   0x1   :  { %11 = vsyncpa [#allocation3 + $0x1], 0  ;;  %s5321_s12 = smov 0   ;;  %s5323_s13 = smov 0  }
   0x2   :  { %s5325_s14 = smov 0   ;;  %s5327_s15 = smov 0  }
   0x3 LB: > { %s5342_s16 = sadd.s32 4294967295, %s5298_s15   ;;  %s3948_s17 = sadd.s32 4294967294, %s5298_s15   ;;  %s5298_s15 = sphi %s5327_s15, %s7373_s15   ;;  %s5294_s14 = sphi %s5325_s14, %s7372_s14   ;;  %s5290_s13 = sphi %s5323_s13, %s7371_s13   ;;  %s5286_s12 = sphi %s5321_s12, %s7370_s12  }
   0x4   : > { %s5346_s18 = sadd.s32 1, %s5298_s15   ;;  %s97_s19 = sadd.s32 1, %s5294_s14 }
   0x5   : > { %s94_s20 = ssub.s32 %s5298_s15, %s5346_s18  ;;  %p107_p0 = scmp.ne.s32.totalorder %s5294_s14, %s5290_s13 }
   0x6   : > { %p95_p1 = scmp.eq.s32.totalorder %s94_s20, 0  ;;  %p108_p2 = scmp.eq.s32.totalorder %s5342_s16, 1 }
   0x7   : > { %p113_p3 = scmp.ne.s32.totalorder %s5290_s13, %s5286_s12  ;;  %p114_p4 = scmp.eq.s32.totalorder %s3948_s17, 1 }
   0x8   : > { %s5357_s21 = scalar_select %p95_p1, %s5294_s14, %s97_s19  }
   0x9   : > { %p5359_p5 = por %p108_p2, %p107_p0  ;;  %p5363_p6 = por %p114_p4, %p113_p3 }
   0xa   : > { %p3951_p7 = scmp.ge.s32.totalorder %s5298_s15, 1  ;;  %p143_p8 = scmp.lt.s32.totalorder %s5298_s15, 3 }
   0xc   : > { %p144_p9 = pnand %p3951_p7, %p143_p8 }
   0xe   : > { %147 = sbr.rel (%p144_p9) target bundleno = 624 (0x270), region = 28 }
  0x13   : > { %v3956_v0 = vld [vmem:[%s7141_s1 + $0x8] sm:$0xff]  ;;  %p172_p10 = scmp.lt.s32.totalorder %s5342_s16, 1  ;;  %v214_v1 = vld [vmem:[%s7141_s1] sm:$0xff]  ;;  %v4021_v2 = vld [vmem:[%s7141_s1 + $0x10] sm:$0xff]  ;;  %vm249_vm0 = vcmask 64512   ;;  %s4445_s8 = sshll.u32 %s5342_s16, 5 }
  0x14   : > { %5196 = vmatprep.subr.mxu1 %v3956_v0  ;;  %4746 = vmatprep.subr.mxu0 %v3956_v0  ;;  %v5411_v9 = vld [vmem:[%s7141_s1 + $0x18] sm:$0xff]  ;;  %v5416_v10 = vld [vmem:[%s7141_s1 + $0x20] sm:$0xff]  ;;  %v5571_v43 = vld [vmem:[%s7141_s1 + $0x28] sm:$0xff]  ;;  %vm3838_vm1 = vcmask 1040384   ;;  %vm3840_vm2 = vcmask 58368   ;;  %s7104_s19 = scalar_lea.hbm %s7143_s3, %s4445_s8 }
  0x15   : > { %5197 = vmatpush3.msra.mxu1 %v3956_v0  ;;  %4747 = vmatpush3.msra.mxu0 %v3956_v0  ;;  %s5380_s30 = scalar_select %p172_p10, %s5342_s16, 1  ;;  %v5576_v44 = vld [vmem:[%s7141_s1 + $0x30] sm:$0xff] }
  0x16   : > { %4796 = vmatprep.subr.mxu1 %v214_v1  ;;  %4846 = vmatprep.subr.mxu0 %v4021_v2  ;;  %s5300_s16 = smov [#allocation2]  }
  0x17   : > { %s5198_s4 = smul.u32 432, %s5380_s30  ;;  %s4448_s29 = sshll.u32 %s5380_s30, 8 }
  0x18   : > { %s6688_s6 = scalar_lea.vmem %s7142_s2, %s4448_s29  ;;  %s169_s30 = sand.u32 1, %s5290_s13  }
  0x19   : > { %s5386_s7 = scalar_lea.vmem %s7140_s0, %s5198_s4  ;;  %s3848_s20 = scalar_lea.sflag [#allocation3], %s169_s30 }
  0x1a   : > { %v215_v3 = vld [vmem:[%s5386_s7 + $0x1] sm:$0xff]  ;;  %v216_v5 = vld [vmem:[%s5386_s7 + $0x9] sm:$0xff]  ;;  %v5400_v7 = vld [vmem:[%s5386_s7 + $0x19] sm:$0xff]  ;;  %s5242_s25 = sshll.u32 %s5300_s16, 4  ;;  %s5243_s25 = int_to_ptr.vmem [resolvable:$false] %s5242_s25 }
  0x1b   : > { %v5390_v4 = vld [vmem:[%s5386_s7 + $0xc1] sm:$0xff]  ;;  %4748 = vmatprep.mubr.msk.f32.mxu0 %vm249_vm0, %v215_v3  ;;  %v5397_v6 = vld [vmem:[%s5386_s7 + $0xc9] sm:$0xff]  ;;  %v5403_v8 = vld [vmem:[%s5386_s7 + $0xd9] sm:$0xff]  ;;  %s5244_s26 = scalar_lea.vmem %s5243_s25, 64 }
  0x1c   : > { %4772 = vmatprep.mubr.msk.f32.mxu1 %vm249_vm0, %v5390_v4  ;;  %4749 = vmatmul.mubr.msk.f32.vlgmr.msra.gmra.mxu0 %vm249_vm0, %v216_v5  ;;  %v5419_v11 = vld [vmem:[%s5386_s7 + $0x21] sm:$0xff]  ;;  %v5429_v13 = vld [vmem:[%s5386_s7 + $0x31] sm:$0xff]  ;;  %v5445_v15 = vld [vmem:[%s5386_s7 + $0x39] sm:$0xff] }
  0x1d   : > { %4773 = vmatmul.mubr.msk.f32.vlgmr.msra.gmra.mxu1 %vm249_vm0, %v5397_v6  ;;  %4847 = vmatpush3.msra.mxu0 %v4021_v2  ;;  %v5422_v12 = vld [vmem:[%s5386_s7 + $0xe1] sm:$0xff]  ;;  %v5432_v14 = vld [vmem:[%s5386_s7 + $0xf1] sm:$0xff]  ;;  %v5448_v16 = vld [vmem:[%s5386_s7 + $0xf9] sm:$0xff] }
  0x1e   : > { %4797 = vmatpush3.msra.mxu1 %v214_v1  ;;  %4751 = vmatprep.mubr.msk.f32.mxu0 %vm249_vm0, %v5400_v7  ;;  %v5451_v17 = vld [vmem:[%s5386_s7 + $0x49] sm:$0xff]  ;;  %v5465_v19 = vld [vmem:[%s5386_s7 + $0x51] sm:$0xff]  ;;  %v5471_v21 = vld [vmem:[%s5386_s7 + $0x61] sm:$0xff] }
  0x1f   : > { %4775 = vmatprep.mubr.msk.f32.mxu1 %vm249_vm0, %v5403_v8  ;;  %4896 = vmatprep.subr.mxu1 %v5411_v9  ;;  %v5454_v18 = vld [vmem:[%s5386_s7 + $0x109] sm:$0xff]  ;;  %v5468_v20 = vld [vmem:[%s5386_s7 + $0x111] sm:$0xff]  ;;  %v5474_v22 = vld [vmem:[%s5386_s7 + $0x121] sm:$0xff] }
  0x20   : > { %4946 = vmatprep.subr.mxu0 %v5416_v10  ;;  %4752 = vmatmul.mubr.msk.f32.gmra.mxu0 %vm249_vm0, %v5419_v11  ;;  %v5485_v23 = vld [vmem:[%s5386_s7 + $0x69] sm:$0xff]  ;;  %v5491_v25 = vld [vmem:[%s5386_s7 + $0x79] sm:$0xff]  ;;  %v5505_v27 = vld [vmem:[%s5386_s7 + $0x81] sm:$0xff] }
  0x21   : > { %4776 = vmatmul.mubr.msk.f32.gmra.mxu1 %vm249_vm0, %v5422_v12  ;;  %4754 = vmatprep.mubr.msk.f32.mxu0 %vm249_vm0, %v5429_v13  ;;  %v5488_v24 = vld [vmem:[%s5386_s7 + $0x129] sm:$0xff]  ;;  %v5494_v26 = vld [vmem:[%s5386_s7 + $0x139] sm:$0xff]  ;;  %v5508_v28 = vld [vmem:[%s5386_s7 + $0x141] sm:$0xff] }
  0x22   : > { %4778 = vmatprep.mubr.msk.f32.mxu1 %vm249_vm0, %v5432_v14  ;;  %v5511_v29 = vld [vmem:[%s5386_s7 + $0x91] sm:$0xff]  ;;  %v5525_v31 = vld [vmem:[%s5386_s7 + $0x99] sm:$0xff]  ;;  %v5531_v33 = vld [vmem:[%s5386_s7 + $0xa9] sm:$0xff] }
  0x23   : > { %v5514_v30 = vld [vmem:[%s5386_s7 + $0x151] sm:$0xff]  ;;  %v5528_v32 = vld [vmem:[%s5386_s7 + $0x159] sm:$0xff]  ;;  %v5534_v34 = vld [vmem:[%s5386_s7 + $0x169] sm:$0xff] }
  0x24   : > { %4755 = vmatmul.mubr.msk.f32.gmra.mxu0 %vm249_vm0, %v5445_v15  ;;  %v5545_v35 = vld [vmem:[%s5386_s7 + $0xb1] sm:$0xff]  ;;  %v182_v37 = vld [vmem:[%s5386_s7] sm:$0xff]  ;;  %v183_v39 = vld [vmem:[%s5386_s7 + $0x8] sm:$0xff] }
  0x25   : > { %4779 = vmatmul.mubr.msk.f32.gmra.mxu1 %vm249_vm0, %v5448_v16  ;;  %4757 = vmatprep.mubr.msk.f32.mxu0 %vm249_vm0, %v5451_v17  ;;  %v5548_v36 = vld [vmem:[%s5386_s7 + $0x171] sm:$0xff]  ;;  %v892_v38 = vld [vmem:[%s5386_s7 + $0x2] sm:$0xff]  ;;  %v5564_v42 = vld [vmem:[%s5386_s7 + $0x1a] sm:$0xff] }
  0x26   : > { %4781 = vmatprep.mubr.msk.f32.mxu1 %vm249_vm0, %v5454_v18  ;;  %7206 = vst [vmem:[#allocation5_spill] sm:$0xff] %v5548_v36  ;;  %v893_v40 = vld [vmem:[%s5386_s7 + $0xa] sm:$0xff]  ;;  %v5561_v41 = vld [vmem:[%s5386_s7 + $0x18] sm:$0xff]  ;;  %7207 = vst [vmem:[#allocation6_spill] sm:$0xff] %v5564_v42 }
  0x27   : > { %v5581_v45 = vld [vmem:[%s5386_s7 + $0x20] sm:$0xff]  ;;  %v5591_v47 = vld [vmem:[%s5386_s7 + $0x30] sm:$0xff]  ;;  %v5607_v49 = vld [vmem:[%s5386_s7 + $0x38] sm:$0xff] }
  0x28   : > { %4758 = vmatmul.mubr.msk.f32.gmra.mxu0 %vm249_vm0, %v5465_v19  ;;  %v5584_v46 = vld [vmem:[%s5386_s7 + $0x22] sm:$0xff]  ;;  %v5594_v48 = vld [vmem:[%s5386_s7 + $0x32] sm:$0xff]  ;;  %v5610_v50 = vld [vmem:[%s5386_s7 + $0x3a] sm:$0xff] }
  0x29   : > { %4782 = vmatmul.mubr.msk.f32.gmra.mxu1 %vm249_vm0, %v5468_v20  ;;  %4760 = vmatprep.mubr.msk.f32.mxu0 %vm249_vm0, %v5471_v21  ;;  %7208 = vst [vmem:[#allocation7_spill] sm:$0xff] %v5584_v46  ;;  %7209 = vst [vmem:[#allocation8_spill] sm:$0xff] %v5594_v48  ;;  %v5613_v51 = vld [vmem:[%s5386_s7 + $0x48] sm:$0xff]  ;;  %v5627_v53 = vld [vmem:[%s5386_s7 + $0x50] sm:$0xff] }
  0x2a   : > { %4784 = vmatprep.mubr.msk.f32.mxu1 %vm249_vm0, %v5474_v22  ;;  %7210 = vst [vmem:[#allocation9_spill] sm:$0xff] %v5610_v50  ;;  %v5616_v52 = vld [vmem:[%s5386_s7 + $0x4a] sm:$0xff]  ;;  %v5630_v54 = vld [vmem:[%s5386_s7 + $0x52] sm:$0xff]  ;;  %v5633_v55 = vld [vmem:[%s5386_s7 + $0x60] sm:$0xff] }
  0x2b   : > { %7211 = vst [vmem:[#allocation10_spill] sm:$0xff] %v5616_v52  ;;  %7212 = vst [vmem:[#allocation11_spill] sm:$0xff] %v5630_v54  ;;  %v5636_v56 = vld [vmem:[%s5386_s7 + $0x62] sm:$0xff]  ;;  %v5650_v58 = vld [vmem:[%s5386_s7 + $0x6a] sm:$0xff] }
  0x2c   : > { %4761 = vmatmul.mubr.msk.f32.gmra.mxu0 %vm249_vm0, %v5485_v23  ;;  %7213 = vst [vmem:[#allocation12_spill] sm:$0xff] %v5636_v56  ;;  %v5647_v57 = vld [vmem:[%s5386_s7 + $0x68] sm:$0xff]  ;;  %7214 = vst [vmem:[#allocation13_spill] sm:$0xff] %v5650_v58  ;;  %v5653_v59 = vld [vmem:[%s5386_s7 + $0x78] sm:$0xff] }
  0x2d   : > { %4785 = vmatmul.mubr.msk.f32.gmra.mxu1 %vm249_vm0, %v5488_v24  ;;  %4763 = vmatprep.mubr.msk.f32.mxu0 %vm249_vm0, %v5491_v25  ;;  %v5656_v60 = vld [vmem:[%s5386_s7 + $0x7a] sm:$0xff]  ;;  %v5670_v62 = vld [vmem:[%s5386_s7 + $0x82] sm:$0xff]  ;;  %v5673_v63 = vld [vmem:[%s5386_s7 + $0x90] sm:$0xff] }
  0x2e   : > { %4787 = vmatprep.mubr.msk.f32.mxu1 %vm249_vm0, %v5494_v26  ;;  %7215 = vst [vmem:[#allocation14_spill] sm:$0xff] %v5656_v60  ;;  %v5667_v61 = vld [vmem:[%s5386_s7 + $0x80] sm:$0xff]  ;;  %7216 = vst [vmem:[#allocation15_spill] sm:$0xff] %v5670_v62  ;;  %v5676_v0 = vld [vmem:[%s5386_s7 + $0x92] sm:$0xff] }
  0x2f   : > { %7217 = vst [vmem:[#allocation16_spill] sm:$0xff] %v5676_v0  ;;  %v5687_v1 = vld [vmem:[%s5386_s7 + $0x98] sm:$0xff]  ;;  %v5693_v3 = vld [vmem:[%s5386_s7 + $0xa8] sm:$0xff] }
  0x30   : > { %4764 = vmatmul.mubr.msk.f32.gmra.mxu0 %vm249_vm0, %v5505_v27  ;;  %v5690_v2 = vld [vmem:[%s5386_s7 + $0x9a] sm:$0xff]  ;;  %v5696_v5 = vld [vmem:[%s5386_s7 + $0xaa] sm:$0xff] }
  0x31   : > { %4788 = vmatmul.mubr.msk.f32.gmra.mxu1 %vm249_vm0, %v5508_v28  ;;  %4766 = vmatprep.mubr.msk.f32.mxu0 %vm249_vm0, %v5511_v29  ;;  %7218 = vst [vmem:[#allocation17_spill] sm:$0xff] %v5690_v2  ;;  %7219 = vst [vmem:[#allocation18_spill] sm:$0xff] %v5696_v5 }
  0x32   : > { %4790 = vmatprep.mubr.msk.f32.mxu1 %vm249_vm0, %v5514_v30 }
  0x34   : > { %4767 = vmatmul.mubr.msk.f32.gmra.mxu0 %vm249_vm0, %v5525_v31 }
  0x35   : > { %4791 = vmatmul.mubr.msk.f32.gmra.mxu1 %vm249_vm0, %v5528_v32  ;;  %4769 = vmatprep.mubr.msk.f32.mxu0 %vm249_vm0, %v5531_v33 }
  0x36   : > { %4793 = vmatprep.mubr.msk.f32.mxu1 %vm249_vm0, %v5534_v34 }
  0x38   : > { %4770 = vmatmul.mubr.msk.f32.gmra.mxu0 %vm249_vm0, %v5545_v35 }
  0x39   : > { %4794 = vmatmul.mubr.msk.f32.gmra.mxu1 %vm249_vm0, %v5548_v36  ;;  %4848 = vmatprep.mubr.msk.f32.mxu0 %vm249_vm0, %v892_v38  ;;  %v5716_v38 = vld [vmem:[%s5386_s7 + $0xc2] sm:$0xff]  ;;  %v5856_v36 = vld [vmem:[%s5386_s7 + $0x16a] sm:$0xff] }
  0x3a   : > { %4798 = vmatprep.mubr.msk.f32.mxu1 %vm249_vm0, %v182_v37  ;;  %v5713_v37 = vld [vmem:[%s5386_s7 + $0xc0] sm:$0xff]  ;;  %7221 = vst [vmem:[#allocation20_spill] sm:$0xff] %v5716_v38  ;;  %7235 = vst [vmem:[#allocation34_spill] sm:$0xff] %v5856_v36 }
  0x3c   : > { %4849 = vmatmul.mubr.msk.f32.vlgmr.msra.gmra.mxu0 %vm249_vm0, %v893_v40  ;;  %v5730_v40 = vld [vmem:[%s5386_s7 + $0xca] sm:$0xff] }
  0x3d   : > { %4799 = vmatmul.mubr.msk.f32.vlgmr.msra.gmra.mxu1 %vm249_vm0, %v183_v39  ;;  %4947 = vmatpush3.msra.mxu0 %v5416_v10  ;;  %v5710_v10 = vld [vmem:[%s5386_s7 + $0xb2] sm:$0xff]  ;;  %v5727_v39 = vld [vmem:[%s5386_s7 + $0xc8] sm:$0xff]  ;;  %7222 = vst [vmem:[#allocation21_spill] sm:$0xff] %v5730_v40 }
  0x3e   : > { %4897 = vmatpush3.msra.mxu1 %v5411_v9  ;;  %4801 = vmatprep.mubr.msk.f32.mxu1 %vm249_vm0, %v5561_v41  ;;  %v5707_v9 = vld [vmem:[%s5386_s7 + $0xb0] sm:$0xff]  ;;  %7220 = vst [vmem:[#allocation19_spill] sm:$0xff] %v5710_v10 }
  0x3f   : > { %4851 = vmatprep.mubr.msk.f32.mxu0 %vm249_vm0, %v5564_v42  ;;  %4996 = vmatprep.subr.mxu1 %v5571_v43  ;;  %v5853_v42 = vld [vmem:[%s5386_s7 + $0x168] sm:$0xff] }
  0x40   : > { %5046 = vmatprep.subr.mxu0 %v5576_v44  ;;  %4852 = vmatmul.mubr.msk.f32.gmra.mxu0 %vm249_vm0, %v5584_v46  ;;  %v5836_v46 = vld [vmem:[%s5386_s7 + $0x152] sm:$0xff] }
  0x41   : > { %4802 = vmatmul.mubr.msk.f32.gmra.mxu1 %vm249_vm0, %v5581_v45  ;;  %4854 = vmatprep.mubr.msk.f32.mxu0 %vm249_vm0, %v5594_v48  ;;  %v5833_v48 = vld [vmem:[%s5386_s7 + $0x150] sm:$0xff]  ;;  %7233 = vst [vmem:[#allocation32_spill] sm:$0xff] %v5836_v46 }
  0x42   : > { %4804 = vmatprep.mubr.msk.f32.mxu1 %vm249_vm0, %v5591_v47 }
  0x44   : > { %4855 = vmatmul.mubr.msk.f32.gmra.mxu0 %vm249_vm0, %v5610_v50  ;;  %v5816_v50 = vld [vmem:[%s5386_s7 + $0x13a] sm:$0xff] }
  0x45   : > { %4805 = vmatmul.mubr.msk.f32.gmra.mxu1 %vm249_vm0, %v5607_v49  ;;  %4857 = vmatprep.mubr.msk.f32.mxu0 %vm249_vm0, %v5616_v52  ;;  %v5813_v52 = vld [vmem:[%s5386_s7 + $0x138] sm:$0xff]  ;;  %7231 = vst [vmem:[#allocation30_spill] sm:$0xff] %v5816_v50 }
  0x46   : > { %4807 = vmatprep.mubr.msk.f32.mxu1 %vm249_vm0, %v5613_v51 }
  0x48   : > { %4858 = vmatmul.mubr.msk.f32.gmra.mxu0 %vm249_vm0, %v5630_v54  ;;  %v5796_v54 = vld [vmem:[%s5386_s7 + $0x122] sm:$0xff] }
  0x49   : > { %4808 = vmatmul.mubr.msk.f32.gmra.mxu1 %vm249_vm0, %v5627_v53  ;;  %4860 = vmatprep.mubr.msk.f32.mxu0 %vm249_vm0, %v5636_v56  ;;  %v5793_v56 = vld [vmem:[%s5386_s7 + $0x120] sm:$0xff]  ;;  %7229 = vst [vmem:[#allocation28_spill] sm:$0xff] %v5796_v54 }
  0x4a   : > { %4810 = vmatprep.mubr.msk.f32.mxu1 %vm249_vm0, %v5633_v55 }
  0x4c   : > { %4861 = vmatmul.mubr.msk.f32.gmra.mxu0 %vm249_vm0, %v5650_v58  ;;  %v5776_v58 = vld [vmem:[%s5386_s7 + $0x10a] sm:$0xff] }
  0x4d   : > { %4811 = vmatmul.mubr.msk.f32.gmra.mxu1 %vm249_vm0, %v5647_v57  ;;  %4863 = vmatprep.mubr.msk.f32.mxu0 %vm249_vm0, %v5656_v60  ;;  %v5773_v60 = vld [vmem:[%s5386_s7 + $0x108] sm:$0xff]  ;;  %7227 = vst [vmem:[#allocation26_spill] sm:$0xff] %v5776_v58 }
  0x4e   : > { %4813 = vmatprep.mubr.msk.f32.mxu1 %vm249_vm0, %v5653_v59 }
  0x50   : > { %4864 = vmatmul.mubr.msk.f32.gmra.mxu0 %vm249_vm0, %v5670_v62  ;;  %v5756_v62 = vld [vmem:[%s5386_s7 + $0xf2] sm:$0xff] }
  0x51   : > { %4814 = vmatmul.mubr.msk.f32.gmra.mxu1 %vm249_vm0, %v5667_v61  ;;  %4866 = vmatprep.mubr.msk.f32.mxu0 %vm249_vm0, %v5676_v0  ;;  %v5753_v0 = vld [vmem:[%s5386_s7 + $0xf0] sm:$0xff]  ;;  %7225 = vst [vmem:[#allocation24_spill] sm:$0xff] %v5756_v62 }
  0x52   : > { %4816 = vmatprep.mubr.msk.f32.mxu1 %vm249_vm0, %v5673_v63 }
  0x54   : > { %4867 = vmatmul.mubr.msk.f32.gmra.mxu0 %vm249_vm0, %v5690_v2  ;;  %v5736_v2 = vld [vmem:[%s5386_s7 + $0xda] sm:$0xff] }
  0x55   : > { %4817 = vmatmul.mubr.msk.f32.gmra.mxu1 %vm249_vm0, %v5687_v1  ;;  %4869 = vmatprep.mubr.msk.f32.mxu0 %vm249_vm0, %v5696_v5  ;;  %v5733_v5 = vld [vmem:[%s5386_s7 + $0xd8] sm:$0xff]  ;;  %7223 = vst [vmem:[#allocation22_spill] sm:$0xff] %v5736_v2 }
  0x56   : > { %4819 = vmatprep.mubr.msk.f32.mxu1 %vm249_vm0, %v5693_v3 }
  0x58   : > { %4870 = vmatmul.mubr.msk.f32.gmra.mxu0 %vm249_vm0, %v5710_v10  ;;  %v5750_v10 = vld [vmem:[%s5386_s7 + $0xe2] sm:$0xff] }
  0x59   : > { %4820 = vmatmul.mubr.msk.f32.gmra.mxu1 %vm249_vm0, %v5707_v9  ;;  %4872 = vmatprep.mubr.msk.f32.mxu0 %vm249_vm0, %v5716_v38  ;;  %v5747_v38 = vld [vmem:[%s5386_s7 + $0xe0] sm:$0xff]  ;;  %7224 = vst [vmem:[#allocation23_spill] sm:$0xff] %v5750_v10 }
  0x5a   : > { %4822 = vmatprep.mubr.msk.f32.mxu1 %vm249_vm0, %v5713_v37 }
  0x5c   : > { %4873 = vmatmul.mubr.msk.f32.gmra.mxu0 %vm249_vm0, %v5730_v40  ;;  %v5770_v40 = vld [vmem:[%s5386_s7 + $0xfa] sm:$0xff] }
  0x5d   : > { %4823 = vmatmul.mubr.msk.f32.gmra.mxu1 %vm249_vm0, %v5727_v39  ;;  %4875 = vmatprep.mubr.msk.f32.mxu0 %vm249_vm0, %v5736_v2  ;;  %v5767_v2 = vld [vmem:[%s5386_s7 + $0xf8] sm:$0xff]  ;;  %7226 = vst [vmem:[#allocation25_spill] sm:$0xff] %v5770_v40 }
  0x5e   : > { %4825 = vmatprep.mubr.msk.f32.mxu1 %vm249_vm0, %v5733_v5 }
  0x60   : > { %4876 = vmatmul.mubr.msk.f32.gmra.mxu0 %vm249_vm0, %v5750_v10  ;;  %v5790_v10 = vld [vmem:[%s5386_s7 + $0x112] sm:$0xff] }
  0x61   : > { %4826 = vmatmul.mubr.msk.f32.gmra.mxu1 %vm249_vm0, %v5747_v38  ;;  %4878 = vmatprep.mubr.msk.f32.mxu0 %vm249_vm0, %v5756_v62  ;;  %v5787_v62 = vld [vmem:[%s5386_s7 + $0x110] sm:$0xff]  ;;  %7228 = vst [vmem:[#allocation27_spill] sm:$0xff] %v5790_v10 }
  0x62   : > { %4828 = vmatprep.mubr.msk.f32.mxu1 %vm249_vm0, %v5753_v0 }
  0x64   : > { %4879 = vmatmul.mubr.msk.f32.gmra.mxu0 %vm249_vm0, %v5770_v40  ;;  %v5810_v40 = vld [vmem:[%s5386_s7 + $0x12a] sm:$0xff] }
  0x65   : > { %4829 = vmatmul.mubr.msk.f32.gmra.mxu1 %vm249_vm0, %v5767_v2  ;;  %4881 = vmatprep.mubr.msk.f32.mxu0 %vm249_vm0, %v5776_v58  ;;  %v5807_v58 = vld [vmem:[%s5386_s7 + $0x128] sm:$0xff]  ;;  %7230 = vst [vmem:[#allocation29_spill] sm:$0xff] %v5810_v40 }
  0x66   : > { %4831 = vmatprep.mubr.msk.f32.mxu1 %vm249_vm0, %v5773_v60 }
  0x68   : > { %4882 = vmatmul.mubr.msk.f32.gmra.mxu0 %vm249_vm0, %v5790_v10  ;;  %v5830_v10 = vld [vmem:[%s5386_s7 + $0x142] sm:$0xff] }
  0x69   : > { %4832 = vmatmul.mubr.msk.f32.gmra.mxu1 %vm249_vm0, %v5787_v62  ;;  %4884 = vmatprep.mubr.msk.f32.mxu0 %vm249_vm0, %v5796_v54  ;;  %v5827_v54 = vld [vmem:[%s5386_s7 + $0x140] sm:$0xff]  ;;  %7232 = vst [vmem:[#allocation31_spill] sm:$0xff] %v5830_v10 }
  0x6a   : > { %4834 = vmatprep.mubr.msk.f32.mxu1 %vm249_vm0, %v5793_v56 }
  0x6c   : > { %4885 = vmatmul.mubr.msk.f32.gmra.mxu0 %vm249_vm0, %v5810_v40  ;;  %v5850_v40 = vld [vmem:[%s5386_s7 + $0x15a] sm:$0xff] }
  0x6d   : > { %4835 = vmatmul.mubr.msk.f32.gmra.mxu1 %vm249_vm0, %v5807_v58  ;;  %4887 = vmatprep.mubr.msk.f32.mxu0 %vm249_vm0, %v5816_v50  ;;  %v5847_v50 = vld [vmem:[%s5386_s7 + $0x158] sm:$0xff]  ;;  %7234 = vst [vmem:[#allocation33_spill] sm:$0xff] %v5850_v40 }
  0x6e   : > { %4837 = vmatprep.mubr.msk.f32.mxu1 %vm249_vm0, %v5813_v52 }
  0x70   : > { %4888 = vmatmul.mubr.msk.f32.gmra.mxu0 %vm249_vm0, %v5830_v10  ;;  %v5870_v10 = vld [vmem:[%s5386_s7 + $0x172] sm:$0xff] }
  0x71   : > { %4838 = vmatmul.mubr.msk.f32.gmra.mxu1 %vm249_vm0, %v5827_v54  ;;  %4890 = vmatprep.mubr.msk.f32.mxu0 %vm249_vm0, %v5836_v46  ;;  %v5867_v46 = vld [vmem:[%s5386_s7 + $0x170] sm:$0xff]  ;;  %7236 = vst [vmem:[#allocation35_spill] sm:$0xff] %v5870_v10 }
  0x72   : > { %4840 = vmatprep.mubr.msk.f32.mxu1 %vm249_vm0, %v5833_v48 }
  0x74   : > { %4891 = vmatmul.mubr.msk.f32.gmra.mxu0 %vm249_vm0, %v5850_v40 }
  0x75   : > { %4841 = vmatmul.mubr.msk.f32.gmra.mxu1 %vm249_vm0, %v5847_v50  ;;  %4893 = vmatprep.mubr.msk.f32.mxu0 %vm249_vm0, %v5856_v36  ;;  %v5887_v36 = vld [vmem:[%s7141_s1 + $0x38] sm:$0xff] }
  0x76   : > { %4843 = vmatprep.mubr.msk.f32.mxu1 %vm249_vm0, %v5853_v42 }
  0x78   : > { %4894 = vmatmul.mubr.msk.f32.gmra.mxu0 %vm249_vm0, %v5870_v10  ;;  %v5892_v10 = vld [vmem:[%s7141_s1 + $0x40] sm:$0xff] }
  0x79   : > { %4844 = vmatmul.mubr.msk.f32.gmra.mxu1 %vm249_vm0, %v5867_v46  ;;  %4948 = vmatprep.mubr.msk.f32.mxu0 %vm249_vm0, %v5400_v7  ;;  %v7238_v7 = vld [vmem:[#allocation5_spill] sm:$0xff] }
  0x7a   : > { %4898 = vmatprep.mubr.msk.f32.mxu1 %vm249_vm0, %v5561_v41 }
  0x7c   : > { %4949 = vmatmul.mubr.msk.f32.vlgmr.msra.gmra.mxu0 %vm249_vm0, %v5419_v11  ;;  %v6024_v11 = vld [vmem:[%s5386_s7 + $0x189] sm:$0xff] }
  0x7d   : > { %4899 = vmatmul.mubr.msk.f32.vlgmr.msra.gmra.mxu1 %vm249_vm0, %v5581_v45  ;;  %5047 = vmatpush3.msra.mxu0 %v5576_v44  ;;  %7239 = vst [vmem:[#allocation5_spill] sm:$0xff] %v6024_v11  ;;  %v7257_v44 = vld [vmem:[#allocation23_spill] sm:$0xff]  ;;  %v7258_v45 = vld [vmem:[#allocation24_spill] sm:$0xff] }
  0x7e   : > { %4997 = vmatpush3.msra.mxu1 %v5571_v43  ;;  %4901 = vmatprep.mubr.msk.f32.mxu1 %vm249_vm0, %v5591_v47 }
  0x7f   : > { %4951 = vmatprep.mubr.msk.f32.mxu0 %vm249_vm0, %v5429_v13  ;;  %5096 = vmatprep.subr.mxu1 %v5887_v36 }
  0x80   : > { %5146 = vmatprep.subr.mxu0 %v5892_v10  ;;  %4952 = vmatmul.mubr.msk.f32.gmra.mxu0 %vm249_vm0, %v5445_v15 }
  0x81   : > { %4902 = vmatmul.mubr.msk.f32.gmra.mxu1 %vm249_vm0, %v5607_v49  ;;  %4954 = vmatprep.mubr.msk.f32.mxu0 %vm249_vm0, %v5451_v17 }
  0x82   : > { %4904 = vmatprep.mubr.msk.f32.mxu1 %vm249_vm0, %v5613_v51 }
  0x84   : > { %4955 = vmatmul.mubr.msk.f32.gmra.mxu0 %vm249_vm0, %v5465_v19 }
  0x85   : > { %4905 = vmatmul.mubr.msk.f32.gmra.mxu1 %vm249_vm0, %v5627_v53  ;;  %4957 = vmatprep.mubr.msk.f32.mxu0 %vm249_vm0, %v5471_v21 }
  0x86   : > { %4907 = vmatprep.mubr.msk.f32.mxu1 %vm249_vm0, %v5633_v55 }
  0x88   : > { %4958 = vmatmul.mubr.msk.f32.gmra.mxu0 %vm249_vm0, %v5485_v23 }
  0x89   : > { %4908 = vmatmul.mubr.msk.f32.gmra.mxu1 %vm249_vm0, %v5647_v57  ;;  %4960 = vmatprep.mubr.msk.f32.mxu0 %vm249_vm0, %v5491_v25 }
  0x8a   : > { %4910 = vmatprep.mubr.msk.f32.mxu1 %vm249_vm0, %v5653_v59 }
  0x8c   : > { %4961 = vmatmul.mubr.msk.f32.gmra.mxu0 %vm249_vm0, %v5505_v27 }
  0x8d   : > { %4911 = vmatmul.mubr.msk.f32.gmra.mxu1 %vm249_vm0, %v5667_v61  ;;  %4963 = vmatprep.mubr.msk.f32.mxu0 %vm249_vm0, %v5511_v29  ;;  %v7249_v29 = vld [vmem:[#allocation15_spill] sm:$0xff] }
  0x8e   : > { %4913 = vmatprep.mubr.msk.f32.mxu1 %vm249_vm0, %v5673_v63 }
  0x90   : > { %4964 = vmatmul.mubr.msk.f32.gmra.mxu0 %vm249_vm0, %v5525_v31  ;;  %v7251_v31 = vld [vmem:[#allocation17_spill] sm:$0xff] }
  0x91   : > { %4914 = vmatmul.mubr.msk.f32.gmra.mxu1 %vm249_vm0, %v5687_v1  ;;  %4966 = vmatprep.mubr.msk.f32.mxu0 %vm249_vm0, %v5531_v33  ;;  %v7253_v33 = vld [vmem:[#allocation19_spill] sm:$0xff] }
  0x92   : > { %4916 = vmatprep.mubr.msk.f32.mxu1 %vm249_vm0, %v5693_v3 }
  0x94   : > { %4967 = vmatmul.mubr.msk.f32.gmra.mxu0 %vm249_vm0, %v5545_v35  ;;  %v7255_v35 = vld [vmem:[#allocation21_spill] sm:$0xff] }
  0x95   : > { %4917 = vmatmul.mubr.msk.f32.gmra.mxu1 %vm249_vm0, %v5707_v9  ;;  %4969 = vmatprep.mubr.msk.f32.mxu0 %vm249_vm0, %v5390_v4  ;;  %v6007_v4 = vld [vmem:[%s5386_s7 + $0x180] sm:$0xff] }
  0x96   : > { %4919 = vmatprep.mubr.msk.f32.mxu1 %vm249_vm0, %v5713_v37 }
  0x98   : > { %4970 = vmatmul.mubr.msk.f32.gmra.mxu0 %vm249_vm0, %v5397_v6  ;;  %v6010_v6 = vld [vmem:[%s5386_s7 + $0x181] sm:$0xff] }
  0x99   : > { %4920 = vmatmul.mubr.msk.f32.gmra.mxu1 %vm249_vm0, %v5727_v39  ;;  %4972 = vmatprep.mubr.msk.f32.mxu0 %vm249_vm0, %v5403_v8  ;;  %7237 = vst [vmem:[#allocation36_spill] sm:$0xff] %v6010_v6  ;;  %v6021_v8 = vld [vmem:[%s5386_s7 + $0x188] sm:$0xff] }
  0x9a   : > { %4922 = vmatprep.mubr.msk.f32.mxu1 %vm249_vm0, %v5733_v5 }
  0x9c   : > { %4973 = vmatmul.mubr.msk.f32.gmra.mxu0 %vm249_vm0, %v5422_v12  ;;  %v7240_v12 = vld [vmem:[#allocation6_spill] sm:$0xff] }
  0x9d   : > { %4923 = vmatmul.mubr.msk.f32.gmra.mxu1 %vm249_vm0, %v5747_v38  ;;  %4975 = vmatprep.mubr.msk.f32.mxu0 %vm249_vm0, %v5432_v14  ;;  %v7241_v14 = vld [vmem:[#allocation7_spill] sm:$0xff] }
  0x9e   : > { %4925 = vmatprep.mubr.msk.f32.mxu1 %vm249_vm0, %v5753_v0 }
  0xa0   : > { %4976 = vmatmul.mubr.msk.f32.gmra.mxu0 %vm249_vm0, %v5448_v16  ;;  %v7242_v16 = vld [vmem:[#allocation8_spill] sm:$0xff] }
  0xa1   : > { %4926 = vmatmul.mubr.msk.f32.gmra.mxu1 %vm249_vm0, %v5767_v2  ;;  %4978 = vmatprep.mubr.msk.f32.mxu0 %vm249_vm0, %v5454_v18  ;;  %v7243_v18 = vld [vmem:[#allocation9_spill] sm:$0xff] }
  0xa2   : > { %4928 = vmatprep.mubr.msk.f32.mxu1 %vm249_vm0, %v5773_v60 }
  0xa4   : > { %4979 = vmatmul.mubr.msk.f32.gmra.mxu0 %vm249_vm0, %v5468_v20  ;;  %v7244_v20 = vld [vmem:[#allocation10_spill] sm:$0xff] }
  0xa5   : > { %4929 = vmatmul.mubr.msk.f32.gmra.mxu1 %vm249_vm0, %v5787_v62  ;;  %4981 = vmatprep.mubr.msk.f32.mxu0 %vm249_vm0, %v5474_v22  ;;  %v7245_v22 = vld [vmem:[#allocation11_spill] sm:$0xff] }
  0xa6   : > { %4931 = vmatprep.mubr.msk.f32.mxu1 %vm249_vm0, %v5793_v56 }
  0xa8   : > { %4982 = vmatmul.mubr.msk.f32.gmra.mxu0 %vm249_vm0, %v5488_v24  ;;  %v7246_v24 = vld [vmem:[#allocation12_spill] sm:$0xff] }
  0xa9   : > { %4932 = vmatmul.mubr.msk.f32.gmra.mxu1 %vm249_vm0, %v5807_v58  ;;  %4984 = vmatprep.mubr.msk.f32.mxu0 %vm249_vm0, %v5494_v26  ;;  %v7247_v26 = vld [vmem:[#allocation13_spill] sm:$0xff] }
  0xaa   : > { %4934 = vmatprep.mubr.msk.f32.mxu1 %vm249_vm0, %v5813_v52 }
  0xac   : > { %4985 = vmatmul.mubr.msk.f32.gmra.mxu0 %vm249_vm0, %v5508_v28  ;;  %v7248_v28 = vld [vmem:[#allocation14_spill] sm:$0xff] }
  0xad   : > { %4935 = vmatmul.mubr.msk.f32.gmra.mxu1 %vm249_vm0, %v5827_v54  ;;  %4987 = vmatprep.mubr.msk.f32.mxu0 %vm249_vm0, %v5514_v30  ;;  %v7250_v30 = vld [vmem:[#allocation16_spill] sm:$0xff] }
  0xae   : > { %4937 = vmatprep.mubr.msk.f32.mxu1 %vm249_vm0, %v5833_v48 }
  0xb0   : > { %4988 = vmatmul.mubr.msk.f32.gmra.mxu0 %vm249_vm0, %v5528_v32  ;;  %v7252_v32 = vld [vmem:[#allocation18_spill] sm:$0xff] }
  0xb1   : > { %4938 = vmatmul.mubr.msk.f32.gmra.mxu1 %vm249_vm0, %v5847_v50  ;;  %4990 = vmatprep.mubr.msk.f32.mxu0 %vm249_vm0, %v5534_v34  ;;  %v7254_v34 = vld [vmem:[#allocation20_spill] sm:$0xff] }
  0xb2   : > { %4940 = vmatprep.mubr.msk.f32.mxu1 %vm249_vm0, %v5853_v42 }
  0xb4   : > { %4991 = vmatmul.mubr.msk.f32.gmra.mxu0 %vm249_vm0, %v7238_v7 }
  0xb5   : > { %4941 = vmatmul.mubr.msk.f32.gmra.mxu1 %vm249_vm0, %v5867_v46  ;;  %4993 = vmatprep.mubr.msk.f32.mxu0 %vm249_vm0, %v6010_v6  ;;  %v4279_v6 = vld [vmem:[%s5386_s7 + $0x198] sm:$0xff] }
  0xb6   : > { %4943 = vmatprep.mubr.msk.f32.mxu1 %vm249_vm0, %v6007_v4 }
  0xb8   : > { %4994 = vmatmul.mubr.msk.f32.gmra.mxu0 %vm249_vm0, %v6024_v11  ;;  %v6197_v11 = vld [vmem:[%s5386_s7 + $0x182] sm:$0xff] }
  0xb9   : > { %4944 = vmatmul.mubr.msk.f32.gmra.mxu1 %vm249_vm0, %v6021_v8  ;;  %5048 = vmatprep.mubr.msk.f32.mxu0 %vm249_vm0, %v5591_v47  ;;  %7272 = vst [vmem:[#allocation10_spill] sm:$0xff] %v6197_v11 }
  0xba   : > { %4998 = vmatprep.mubr.msk.f32.mxu1 %vm249_vm0, %v7240_v12 }
  0xbc   : > { %5049 = vmatmul.mubr.msk.f32.vlgmr.msra.gmra.mxu0 %vm249_vm0, %v5607_v49 }
  0xbd   : > { %4999 = vmatmul.mubr.msk.f32.vlgmr.msra.gmra.mxu1 %vm249_vm0, %v7241_v14  ;;  %5147 = vmatpush3.msra.mxu0 %v5892_v10 }
  0xbe   : > { %5097 = vmatpush3.msra.mxu1 %v5887_v36  ;;  %5001 = vmatprep.mubr.msk.f32.mxu1 %vm249_vm0, %v7242_v16  ;;  %v7256_v36 = vld [vmem:[#allocation22_spill] sm:$0xff] }
  0xbf   : > { %5051 = vmatprep.mubr.msk.f32.mxu0 %vm249_vm0, %v5613_v51 }
  0xc0   : > { %5052 = vmatmul.mubr.msk.f32.gmra.mxu0 %vm249_vm0, %v5627_v53 }
  0xc1   : > { %5002 = vmatmul.mubr.msk.f32.gmra.mxu1 %vm249_vm0, %v7243_v18  ;;  %5054 = vmatprep.mubr.msk.f32.mxu0 %vm249_vm0, %v5633_v55  ;;  %v7259_v55 = vld [vmem:[#allocation25_spill] sm:$0xff] }
  0xc2   : > { %5004 = vmatprep.mubr.msk.f32.mxu1 %vm249_vm0, %v7244_v20 }
  0xc4   : > { %5055 = vmatmul.mubr.msk.f32.gmra.mxu0 %vm249_vm0, %v5647_v57  ;;  %v7260_v57 = vld [vmem:[#allocation26_spill] sm:$0xff] }
  0xc5   : > { %5005 = vmatmul.mubr.msk.f32.gmra.mxu1 %vm249_vm0, %v7245_v22  ;;  %5057 = vmatprep.mubr.msk.f32.mxu0 %vm249_vm0, %v5653_v59 }
  0xc6   : > { %5007 = vmatprep.mubr.msk.f32.mxu1 %vm249_vm0, %v7246_v24 }
  0xc8   : > { %5058 = vmatmul.mubr.msk.f32.gmra.mxu0 %vm249_vm0, %v5667_v61 }
  0xc9   : > { %5008 = vmatmul.mubr.msk.f32.gmra.mxu1 %vm249_vm0, %v7247_v26  ;;  %5060 = vmatprep.mubr.msk.f32.mxu0 %vm249_vm0, %v5673_v63 }
  0xca   : > { %5010 = vmatprep.mubr.msk.f32.mxu1 %vm249_vm0, %v7248_v28 }
  0xcc   : > { %5061 = vmatmul.mubr.msk.f32.gmra.mxu0 %vm249_vm0, %v5687_v1 }
  0xcd   : > { %5011 = vmatmul.mubr.msk.f32.gmra.mxu1 %vm249_vm0, %v7249_v29  ;;  %5063 = vmatprep.mubr.msk.f32.mxu0 %vm249_vm0, %v5693_v3 }
  0xce   : > { %5013 = vmatprep.mubr.msk.f32.mxu1 %vm249_vm0, %v7250_v30 }
  0xd0   : > { %5064 = vmatmul.mubr.msk.f32.gmra.mxu0 %vm249_vm0, %v5707_v9 }
  0xd1   : > { %5014 = vmatmul.mubr.msk.f32.gmra.mxu1 %vm249_vm0, %v7251_v31  ;;  %5066 = vmatprep.mubr.msk.f32.mxu0 %vm249_vm0, %v5713_v37 }
  0xd2   : > { %5016 = vmatprep.mubr.msk.f32.mxu1 %vm249_vm0, %v7252_v32 }
  0xd4   : > { %5067 = vmatmul.mubr.msk.f32.gmra.mxu0 %vm249_vm0, %v5727_v39 }
  0xd5   : > { %5017 = vmatmul.mubr.msk.f32.gmra.mxu1 %vm249_vm0, %v7253_v33  ;;  %5069 = vmatprep.mubr.msk.f32.mxu0 %vm249_vm0, %v5733_v5  ;;  %v7263_v5 = vld [vmem:[#allocation29_spill] sm:$0xff] }
  0xd6   : > { %5019 = vmatprep.mubr.msk.f32.mxu1 %vm249_vm0, %v7254_v34 }
  0xd8   : > { %5070 = vmatmul.mubr.msk.f32.gmra.mxu0 %vm249_vm0, %v5747_v38  ;;  %v7266_v38 = vld [vmem:[#allocation31_spill] sm:$0xff] }
  0xd9   : > { %5020 = vmatmul.mubr.msk.f32.gmra.mxu1 %vm249_vm0, %v7255_v35  ;;  %5072 = vmatprep.mubr.msk.f32.mxu0 %vm249_vm0, %v5753_v0  ;;  %v7261_v0 = vld [vmem:[#allocation27_spill] sm:$0xff] }
  0xda   : > { %5022 = vmatprep.mubr.msk.f32.mxu1 %vm249_vm0, %v7256_v36 }
  0xdc   : > { %v6100_v41 = vpop.f32.mrf.mxu0  ;;  %5073 = vmatmul.mubr.msk.f32.gmra.mxu0 %vm249_vm0, %v5767_v2 }
  0xdd   : > { %v6102_v43 = vpop.f32.mrf.mxu1  ;;  %5023 = vmatmul.mubr.msk.f32.gmra.mxu1 %vm249_vm0, %v7257_v44  ;;  %5075 = vmatprep.mubr.msk.f32.mxu0 %vm249_vm0, %v5773_v60 }
  0xde   : > { %5025 = vmatprep.mubr.msk.f32.mxu1 %vm249_vm0, %v7258_v45  ;;  %v6112_v47 = vpop.f32.mrf.mxu0 }
  0xdf   : > { %v6114_v49 = vpop.f32.mrf.mxu1 }
  0xe0   : > { %v6116_v51 = vpop.f32.mrf.mxu0  ;;  %5076 = vmatmul.mubr.msk.f32.gmra.mxu0 %vm249_vm0, %v5787_v62  ;;  %v7262_v62 = vld [vmem:[#allocation28_spill] sm:$0xff] }
  0xe1   : > { %v6118_v53 = vpop.f32.mrf.mxu1  ;;  %5026 = vmatmul.mubr.msk.f32.gmra.mxu1 %vm249_vm0, %v7259_v55  ;;  %5078 = vmatprep.mubr.msk.f32.mxu0 %vm249_vm0, %v5793_v56 }
  0xe2   : > { %5028 = vmatprep.mubr.msk.f32.mxu1 %vm249_vm0, %v7260_v57  ;;  %v6128_v59 = vpop.f32.mrf.mxu0 }
  0xe3   : > { %v6130_v60 = vpop.f32.mrf.mxu1 }
  0xe4   : > { %v6132_v61 = vpop.f32.mrf.mxu0  ;;  %5079 = vmatmul.mubr.msk.f32.gmra.mxu0 %vm249_vm0, %v5807_v58  ;;  %v7264_v58 = vld [vmem:[#allocation30_spill] sm:$0xff] }
  0xe5   : > { %v6134_v63 = vpop.f32.mrf.mxu1  ;;  %5029 = vmatmul.mubr.msk.f32.gmra.mxu1 %vm249_vm0, %v7261_v0  ;;  %5081 = vmatprep.mubr.msk.f32.mxu0 %vm249_vm0, %v5813_v52 }
  0xe6   : > { %5031 = vmatprep.mubr.msk.f32.mxu1 %vm249_vm0, %v7262_v62  ;;  %v6144_v56 = vpop.f32.mrf.mxu0 }
  0xe7   : > { %v6146_v1 = vpop.f32.mrf.mxu1 }
  0xe8   : > { %v6148_v2 = vpop.f32.mrf.mxu0  ;;  %5082 = vmatmul.mubr.msk.f32.gmra.mxu0 %vm249_vm0, %v5827_v54  ;;  %v7267_v54 = vld [vmem:[#allocation32_spill] sm:$0xff] }
  0xe9   : > { %v6150_v3 = vpop.f32.mrf.mxu1  ;;  %5032 = vmatmul.mubr.msk.f32.gmra.mxu1 %vm249_vm0, %v7263_v5  ;;  %5084 = vmatprep.mubr.msk.f32.mxu0 %vm249_vm0, %v5833_v48 }
  0xea   : > { %5034 = vmatprep.mubr.msk.f32.mxu1 %vm249_vm0, %v7264_v58  ;;  %v6160_v52 = vpop.f32.mrf.mxu0 }
  0xeb   : > { %v6162_v9 = vpop.f32.mrf.mxu1 }
  0xec   : > { %v6164_v10 = vpop.f32.mrf.mxu0  ;;  %5085 = vmatmul.mubr.msk.f32.gmra.mxu0 %vm249_vm0, %v5847_v50  ;;  %v7270_v50 = vld [vmem:[#allocation34_spill] sm:$0xff] }
  0xed   : > { %v6166_v37 = vpop.f32.mrf.mxu1  ;;  %5035 = vmatmul.mubr.msk.f32.gmra.mxu1 %vm249_vm0, %v7266_v38  ;;  %5087 = vmatprep.mubr.msk.f32.mxu0 %vm249_vm0, %v5853_v42 }
  0xee   : > { %7265 = vst [vmem:[#allocation6_spill] sm:$0xff] %v6166_v37  ;;  %5037 = vmatprep.mubr.msk.f32.mxu1 %vm249_vm0, %v7267_v54  ;;  %v6176_v48 = vpop.f32.mrf.mxu0  ;;  %v7274_v37 = vld [vmem:[#allocation35_spill] sm:$0xff] }
  0xef   : > { %v6178_v39 = vpop.f32.mrf.mxu1 }
  0xf0   : > { %7268 = vst [vmem:[#allocation7_spill] sm:$0xff] %v6178_v39  ;;  %v6180_v7 = vpop.f32.mrf.mxu0  ;;  %5088 = vmatmul.mubr.msk.f32.gmra.mxu0 %vm249_vm0, %v5867_v46  ;;  %v6212_v46 = vld [vmem:[%s5386_s7 + $0x18a] sm:$0xff] }
  0xf1   : > { %v6182_v12 = vpop.f32.mrf.mxu1  ;;  %5038 = vmatmul.mubr.msk.f32.gmra.mxu1 %vm249_vm0, %v5850_v40  ;;  %5090 = vmatprep.mubr.msk.f32.mxu0 %vm249_vm0, %v6007_v4  ;;  %7275 = vst [vmem:[#allocation12_spill] sm:$0xff] %v6212_v46  ;;  %v4280_v4 = vld [vmem:[%s5386_s7 + $0x1a0] sm:$0xff] }
  0xf2   : > { %7269 = vst [vmem:[#allocation8_spill] sm:$0xff] %v6182_v12  ;;  %5040 = vmatprep.mubr.msk.f32.mxu1 %vm249_vm0, %v7270_v50  ;;  %v6192_v42 = vpop.f32.mrf.mxu0 }
  0xf3   : > { %v6194_v14 = vpop.f32.mrf.mxu1 }
  0xf4   : > { %7271 = vst [vmem:[#allocation9_spill] sm:$0xff] %v6194_v14  ;;  %v6200_v12 = vpop.f32.mrf.mxu0  ;;  %5091 = vmatmul.mubr.msk.f32.gmra.mxu0 %vm249_vm0, %v6021_v8 }
  0xf5   : > { %v6202_v39 = vpop.f32.mrf.mxu1  ;;  %5041 = vmatmul.mubr.msk.f32.gmra.mxu1 %vm249_vm0, %v7274_v37  ;;  %5093 = vmatprep.mubr.msk.f32.mxu0 %vm249_vm0, %v4279_v6 }
  0xf6   : > { %7273 = vst [vmem:[#allocation11_spill] sm:$0xff] %v6202_v39  ;;  %5043 = vmatprep.mubr.msk.f32.mxu1 %vm249_vm0, %v6197_v11  ;;  %v6215_v50 = vpop.f32.mrf.mxu0 }
  0xf7   : > { %v6217_v14 = vpop.f32.mrf.mxu1 }
  0xf8   : > { %7276 = vst [vmem:[#allocation13_spill] sm:$0xff] %v6217_v14  ;;  %v6219_v40 = vpop.f32.mrf.mxu0  ;;  %5094 = vmatmul.mubr.msk.f32.gmra.mxu0 %vm249_vm0, %v4280_v4 }
  0xf9   : > { %v6221_v39 = vpop.f32.mrf.mxu1  ;;  %5044 = vmatmul.mubr.msk.f32.gmra.mxu1 %vm249_vm0, %v6212_v46  ;;  %5148 = vmatprep.mubr.msk.f32.mxu0 %vm249_vm0, %v7242_v16 }
  0xfa   : > { %7277 = vst [vmem:[#allocation14_spill] sm:$0xff] %v6221_v39  ;;  %5098 = vmatprep.mubr.msk.f32.mxu1 %vm249_vm0, %v5429_v13  ;;  %v6230_v6 = vpop.f32.mrf.mxu0 }
  0xfb   : > { %v6232_v8 = vpop.f32.mrf.mxu1 }
  0xfc   : > { %7278 = vst [vmem:[#allocation15_spill] sm:$0xff] %v6232_v8  ;;  %v4850_v14 = vpop.f32.mrf.mxu0  ;;  %5149 = vmatmul.mubr.msk.f32.vlgmr.msra.gmra.mxu0 %vm249_vm0, %v7243_v18 }
  0xfd   : > { %v4800_v37 = vpop.f32.mrf.mxu1  ;;  %5099 = vmatmul.mubr.msk.f32.vlgmr.msra.gmra.mxu1 %vm249_vm0, %v5445_v15  ;;  %5151 = vmatprep.mubr.msk.f32.mxu0 %vm249_vm0, %v7244_v20 }
  0xfe   : > { %v739_v4 = vadd.f32 %v4800_v37, %v6100_v41  ;;  %5101 = vmatprep.mubr.msk.f32.mxu1 %vm249_vm0, %v5451_v17  ;;  %v1088_v16 = vpop.f32.mrf.mxu0  ;;  %v4324_v37 = vld [vmem:[%s5386_s7 + $0xa9] sm:$0xff] }
  0xff   : > { %v733_v13 = vpop.f32.mrf.mxu1 }
 0x100   : > { %v6243_v39 = vadd.f32 %v4850_v14, %v739_v4  ;;  %v734_v8 = vadd.f32 %v733_v13, %v6112_v47  ;;  %v4853_v11 = vpop.f32.mrf.mxu0  ;;  %5152 = vmatmul.mubr.msk.f32.gmra.mxu0 %vm249_vm0, %v7245_v22 }
 0x101   : > { %v4803_v46 = vpop.f32.mrf.mxu1  ;;  %5102 = vmatmul.mubr.msk.f32.gmra.mxu1 %vm249_vm0, %v5465_v19  ;;  %5154 = vmatprep.mubr.msk.f32.mxu0 %vm249_vm0, %v7246_v24 }
 0x102   : > { %v6250_v15 = vadd.f32 %v1088_v16, %v734_v8  ;;  %v749_v17 = vadd.f32 %v4803_v46, %v6116_v51  ;;  %5104 = vmatprep.mubr.msk.f32.mxu1 %vm249_vm0, %v5471_v21  ;;  %v1098_v20 = vpop.f32.mrf.mxu0  ;;  %v4322_v51 = vld [vmem:[%s5386_s7 + $0x91] sm:$0xff] }
 0x103   : > { %v743_v18 = vpop.f32.mrf.mxu1  ;;  %v4325_v16 = vld [vmem:[%s5386_s7 + $0xb1] sm:$0xff] }
 0x104   : > { %v6257_v41 = vadd.f32 %v4853_v11, %v749_v17  ;;  %v744_v19 = vadd.f32 %v743_v18, %v6128_v59  ;;  %v4856_v14 = vpop.f32.mrf.mxu0  ;;  %5155 = vmatmul.mubr.msk.f32.gmra.mxu0 %vm249_vm0, %v7247_v26  ;;  %v4326_v18 = vld [vmem:[%s5386_s7 + $0xc1] sm:$0xff] }
 0x105   : > { %v4806_v47 = vpop.f32.mrf.mxu1  ;;  %5105 = vmatmul.mubr.msk.f32.gmra.mxu1 %vm249_vm0, %v5485_v23  ;;  %5157 = vmatprep.mubr.msk.f32.mxu0 %vm249_vm0, %v7248_v28 }
 0x106   : > { %v6264_v22 = vadd.f32 %v1098_v20, %v744_v19  ;;  %v759_v21 = vadd.f32 %v4806_v47, %v6132_v61  ;;  %5107 = vmatprep.mubr.msk.f32.mxu1 %vm249_vm0, %v5491_v25  ;;  %v1108_v24 = vpop.f32.mrf.mxu0  ;;  %v4323_v61 = vld [vmem:[%s5386_s7 + $0x99] sm:$0xff] }
 0x107   : > { %v753_v11 = vpop.f32.mrf.mxu1 }
 0x108   : > { %v6272_v59 = vadd.f32 %v4856_v14, %v759_v21  ;;  %v754_v23 = vadd.f32 %v753_v11, %v6144_v56  ;;  %v4859_v46 = vpop.f32.mrf.mxu0  ;;  %5158 = vmatmul.mubr.msk.f32.gmra.mxu0 %vm249_vm0, %v7249_v29  ;;  %v4327_v14 = vld [vmem:[%s5386_s7 + $0xc9] sm:$0xff]  ;;  %v4328_v11 = vld [vmem:[%s5386_s7 + $0xd9] sm:$0xff] }
 0x109   : > { %v4809_v26 = vpop.f32.mrf.mxu1  ;;  %5108 = vmatmul.mubr.msk.f32.gmra.mxu1 %vm249_vm0, %v5505_v27  ;;  %5160 = vmatprep.mubr.msk.f32.mxu0 %vm249_vm0, %v7250_v30 }
 0x10a   : > { %v6279_v25 = vadd.f32 %v1108_v24, %v754_v23  ;;  %v769_v28 = vadd.f32 %v4809_v26, %v6148_v2  ;;  %5110 = vmatprep.mubr.msk.f32.mxu1 %vm249_vm0, %v4322_v51  ;;  %v1118_v8 = vpop.f32.mrf.mxu0  ;;  %v4329_v26 = vld [vmem:[%s5386_s7 + $0xe1] sm:$0xff] }
 0x10b   : > { %v763_v56 = vpop.f32.mrf.mxu1 }
 0x10c   : > { %v6287_v4 = vadd.f32 %v4859_v46, %v769_v28  ;;  %v764_v27 = vadd.f32 %v763_v56, %v6160_v52  ;;  %v4862_v13 = vpop.f32.mrf.mxu0  ;;  %5161 = vmatmul.mubr.msk.f32.gmra.mxu0 %vm249_vm0, %v7251_v31  ;;  %v4330_v28 = vld [vmem:[%s5386_s7 + $0xf1] sm:$0xff] }
 0x10d   : > { %v4812_v29 = vpop.f32.mrf.mxu1  ;;  %5111 = vmatmul.mubr.msk.f32.gmra.mxu1 %vm249_vm0, %v4323_v61  ;;  %5163 = vmatprep.mubr.msk.f32.mxu0 %vm249_vm0, %v7252_v32 }
 0x10e   : > { %v6293_v2 = vadd.f32 %v1118_v8, %v764_v27  ;;  %v779_v30 = vadd.f32 %v4812_v29, %v6164_v10  ;;  %5113 = vmatprep.mubr.msk.f32.mxu1 %vm249_vm0, %v4324_v37  ;;  %v1128_v52 = vpop.f32.mrf.mxu0  ;;  %v4331_v37 = vld [vmem:[%s5386_s7 + $0xf9] sm:$0xff]  ;;  %v4332_v29 = vld [vmem:[%s5386_s7 + $0x109] sm:$0xff] }
 0x10f   : > { %v773_v17 = vpop.f32.mrf.mxu1 }
 0x110   : > { %v6301_v20 = vadd.f32 %v4862_v13, %v779_v30  ;;  %v774_v19 = vadd.f32 %v773_v17, %v6176_v48  ;;  %v4865_v47 = vpop.f32.mrf.mxu0  ;;  %5164 = vmatmul.mubr.msk.f32.gmra.mxu0 %vm249_vm0, %v7253_v33  ;;  %v4333_v17 = vld [vmem:[%s5386_s7 + $0x111] sm:$0xff] }
 0x111   : > { %v4815_v31 = vpop.f32.mrf.mxu1  ;;  %5114 = vmatmul.mubr.msk.f32.gmra.mxu1 %vm249_vm0, %v4325_v16  ;;  %5166 = vmatprep.mubr.msk.f32.mxu0 %vm249_vm0, %v7254_v34 }
 0x112   : > { %v6307_v10 = vadd.f32 %v1128_v52, %v774_v19  ;;  %v789_v32 = vadd.f32 %v4815_v31, %v6180_v7  ;;  %5116 = vmatprep.mubr.msk.f32.mxu1 %vm249_vm0, %v4326_v18  ;;  %v1138_v48 = vpop.f32.mrf.mxu0  ;;  %v4334_v18 = vld [vmem:[%s5386_s7 + $0x121] sm:$0xff] }
 0x113   : > { %v783_v21 = vpop.f32.mrf.mxu1 }
 0x114   : > { %v6315_v24 = vadd.f32 %v4865_v47, %v789_v32  ;;  %v784_v51 = vadd.f32 %v783_v21, %v6192_v42  ;;  %v4868_v23 = vpop.f32.mrf.mxu0  ;;  %5167 = vmatmul.mubr.msk.f32.gmra.mxu0 %vm249_vm0, %v7255_v35  ;;  %v4335_v32 = vld [vmem:[%s5386_s7 + $0x129] sm:$0xff]  ;;  %v4336_v21 = vld [vmem:[%s5386_s7 + $0x139] sm:$0xff] }
 0x115   : > { %v4818_v33 = vpop.f32.mrf.mxu1  ;;  %5117 = vmatmul.mubr.msk.f32.gmra.mxu1 %vm249_vm0, %v4327_v14  ;;  %5169 = vmatprep.mubr.msk.f32.mxu0 %vm249_vm0, %v7256_v36 }
 0x116   : > { %v6321_v7 = vadd.f32 %v1138_v48, %v784_v51  ;;  %v799_v34 = vadd.f32 %v4818_v33, %v6200_v12  ;;  %5119 = vmatprep.mubr.msk.f32.mxu1 %vm249_vm0, %v4328_v11  ;;  %v1148_v42 = vpop.f32.mrf.mxu0  ;;  %v4337_v33 = vld [vmem:[%s5386_s7 + $0x141] sm:$0xff] }
 0x117   : > { %v793_v46 = vpop.f32.mrf.mxu1 }
 0x118   : > { %v6329_v61 = vadd.f32 %v4868_v23, %v799_v34  ;;  %v794_v56 = vadd.f32 %v793_v46, %v6215_v50  ;;  %v4871_v8 = vpop.f32.mrf.mxu0  ;;  %5170 = vmatmul.mubr.msk.f32.gmra.mxu0 %vm249_vm0, %v7257_v44  ;;  %v4338_v34 = vld [vmem:[%s5386_s7 + $0x151] sm:$0xff] }
 0x119   : > { %v4821_v35 = vpop.f32.mrf.mxu1  ;;  %5120 = vmatmul.mubr.msk.f32.gmra.mxu1 %vm249_vm0, %v4329_v26  ;;  %5172 = vmatprep.mubr.msk.f32.mxu0 %vm249_vm0, %v7258_v45 }
 0x11a   : > { %v6335_v12 = vadd.f32 %v1148_v42, %v794_v56  ;;  %v809_v36 = vadd.f32 %v4821_v35, %v6219_v40  ;;  %5122 = vmatprep.mubr.msk.f32.mxu1 %vm249_vm0, %v4330_v28  ;;  %v1158_v50 = vpop.f32.mrf.mxu0  ;;  %v4339_v28 = vld [vmem:[%s5386_s7 + $0x159] sm:$0xff]  ;;  %v4340_v35 = vld [vmem:[%s5386_s7 + $0x169] sm:$0xff] }
 0x11b   : > { %v803_v27 = vpop.f32.mrf.mxu1 }
 0x11c   : > { %v6343_v13 = vadd.f32 %v4871_v8, %v809_v36  ;;  %v804_v30 = vadd.f32 %v803_v27, %v6230_v6  ;;  %v4874_v16 = vpop.f32.mrf.mxu0  ;;  %5173 = vmatmul.mubr.msk.f32.gmra.mxu0 %vm249_vm0, %v7259_v55  ;;  %v4405_v8 = vld [vmem:[%s5386_s7 + $0x16a] sm:$0xff] }
 0x11d   : > { %v4824_v44 = vpop.f32.mrf.mxu1  ;;  %5123 = vmatmul.mubr.msk.f32.gmra.mxu1 %vm249_vm0, %v4331_v37  ;;  %5175 = vmatprep.mubr.msk.f32.mxu0 %vm249_vm0, %v7260_v57 }
 0x11e   : > { %v6349_v40 = vadd.f32 %v1158_v50, %v804_v30  ;;  %v819_v45 = vadd.f32 %v4824_v44, %v6102_v43  ;;  %5125 = vmatprep.mubr.msk.f32.mxu1 %vm249_vm0, %v4332_v29  ;;  %v1168_v6 = vpop.f32.mrf.mxu0  ;;  %v4341_v30 = vld [vmem:[%s5386_s7 + $0x171] sm:$0xff] }
 0x11f   : > { %v813_v52 = vpop.f32.mrf.mxu1  ;;  %v4406_v44 = vld [vmem:[%s5386_s7 + $0x172] sm:$0xff] }
 0x120   : > { %v6357_v19 = vadd.f32 %v4874_v16, %v819_v45  ;;  %v814_v31 = vadd.f32 %v813_v52, %v6114_v49  ;;  %v4877_v47 = vpop.f32.mrf.mxu0  ;;  %5176 = vmatmul.mubr.msk.f32.gmra.mxu0 %vm249_vm0, %v7261_v0 }
 0x121   : > { %v4827_v55 = vpop.f32.mrf.mxu1  ;;  %5126 = vmatmul.mubr.msk.f32.gmra.mxu1 %vm249_vm0, %v4333_v17  ;;  %5178 = vmatprep.mubr.msk.f32.mxu0 %vm249_vm0, %v7262_v62  ;;  %v7281_v17 = vld [vmem:[#allocation7_spill] sm:$0xff] }
 0x122   : > { %v6363_v43 = vadd.f32 %v1168_v6, %v814_v31  ;;  %v829_v57 = vadd.f32 %v4827_v55, %v6118_v53  ;;  %5128 = vmatprep.mubr.msk.f32.mxu1 %vm249_vm0, %v4334_v18  ;;  %v1178_v49 = vpop.f32.mrf.mxu0  ;;  %v7282_v55 = vld [vmem:[#allocation8_spill] sm:$0xff] }
 0x123   : > { %v823_v14 = vpop.f32.mrf.mxu1 }
 0x124   : > { %v6371_v48 = vadd.f32 %v4877_v47, %v829_v57  ;;  %v824_v11 = vadd.f32 %v823_v14, %v6130_v60  ;;  %v4880_v51 = vpop.f32.mrf.mxu0  ;;  %5179 = vmatmul.mubr.msk.f32.gmra.mxu0 %vm249_vm0, %v7263_v5  ;;  %v7283_v57 = vld [vmem:[#allocation36_spill] sm:$0xff] }
 0x125   : > { %v4830_v0 = vpop.f32.mrf.mxu1  ;;  %5129 = vmatmul.mubr.msk.f32.gmra.mxu1 %vm249_vm0, %v4335_v32  ;;  %5181 = vmatprep.mubr.msk.f32.mxu0 %vm249_vm0, %v7264_v58  ;;  %v7284_v32 = vld [vmem:[#allocation10_spill] sm:$0xff] }
 0x126   : > { %v6377_v53 = vadd.f32 %v1178_v49, %v824_v11  ;;  %v839_v62 = vadd.f32 %v4830_v0, %v6134_v63  ;;  %5131 = vmatprep.mubr.msk.f32.mxu1 %vm249_vm0, %v4336_v21  ;;  %v1188_v60 = vpop.f32.mrf.mxu0  ;;  %v4344_v21 = vld [vmem:[%s5386_s7 + $0x199] sm:$0xff] }
 0x127   : > { %v833_v23 = vpop.f32.mrf.mxu1  ;;  %v4409_v11 = vld [vmem:[%s5386_s7 + $0x19a] sm:$0xff] }
 0x128   : > { %v6385_v26 = vadd.f32 %v4880_v51, %v839_v62  ;;  %v834_v5 = vadd.f32 %v833_v23, %v6146_v1  ;;  %v4883_v42 = vpop.f32.mrf.mxu0  ;;  %5182 = vmatmul.mubr.msk.f32.gmra.mxu0 %vm249_vm0, %v7266_v38  ;;  %v7285_v51 = vld [vmem:[#allocation9_spill] sm:$0xff] }
 0x129   : > { %v4833_v46 = vpop.f32.mrf.mxu1  ;;  %5132 = vmatmul.mubr.msk.f32.gmra.mxu1 %vm249_vm0, %v4337_v33  ;;  %5184 = vmatprep.mubr.msk.f32.mxu0 %vm249_vm0, %v7267_v54  ;;  %v7280_v54 = vld [vmem:[#allocation6_spill] sm:$0xff] }
 0x12a   : > { %v6391_v63 = vadd.f32 %v1188_v60, %v834_v5  ;;  %v849_v58 = vadd.f32 %v4833_v46, %v6150_v3  ;;  %5134 = vmatprep.mubr.msk.f32.mxu1 %vm249_vm0, %v4338_v34  ;;  %v1198_v56 = vpop.f32.mrf.mxu0  ;;  %v7279_v3 = vld [vmem:[#allocation33_spill] sm:$0xff]  ;;  %v7287_v34 = vld [vmem:[#allocation12_spill] sm:$0xff]  ;;  %v7288_v46 = vld [vmem:[#allocation11_spill] sm:$0xff] }
 0x12b   : > { %v843_v1 = vpop.f32.mrf.mxu1  ;;  %v7286_v60 = vld [vmem:[#allocation5_spill] sm:$0xff] }
 0x12c   : > { %v6400_v36 = vadd.f32 %v4883_v42, %v849_v58  ;;  %v844_v38 = vadd.f32 %v843_v1, %v6162_v9  ;;  %v4886_v27 = vpop.f32.mrf.mxu0  ;;  %5185 = vmatmul.mubr.msk.f32.gmra.mxu0 %vm249_vm0, %v7279_v3  ;;  %v4345_v58 = vld [vmem:[%s5386_s7 + $0x1a1] sm:$0xff] }
 0x12d   : > { %v4836_v37 = vpop.f32.mrf.mxu1  ;;  %5135 = vmatmul.mubr.msk.f32.gmra.mxu1 %vm249_vm0, %v4339_v28  ;;  %5187 = vmatprep.mubr.msk.f32.mxu0 %vm249_vm0, %v4405_v8  ;;  %v4410_v28 = vld [vmem:[%s5386_s7 + $0x1a2] sm:$0xff]  ;;  %s3952_s7 = sshll.u32 %s169_s30, 1 }
 0x12e   : > { %v6406_v50 = vadd.f32 %v1198_v56, %v844_v38  ;;  %v859_v29 = vadd.f32 %v4836_v37, %v7280_v54  ;;  %5137 = vmatprep.mubr.msk.f32.mxu1 %vm249_vm0, %v4340_v35  ;;  %v1208_v16 = vpop.f32.mrf.mxu0  ;;  %v7289_v8 = vld [vmem:[#allocation13_spill] sm:$0xff]  ;;  %v7290_v54 = vld [vmem:[#allocation14_spill] sm:$0xff]  ;;  %s171_s9 = scalar_lea.vmem [#allocation2], %s3952_s7 }
 0x12f   : > { %v853_v9 = vpop.f32.mrf.mxu1  ;;  %s3864_s10 = sshll.u32 %s171_s9, 4  ;;  %s3865_s10 = int_to_ptr.vmem [resolvable:$true] %s3864_s10 }
 0x130   : > { %v6413_v45 = vadd.f32 %v4886_v27, %v859_v29  ;;  %v854_v52 = vadd.f32 %v853_v9, %v7281_v17  ;;  %v4889_v18 = vpop.f32.mrf.mxu0  ;;  %5188 = vmatmul.mubr.msk.f32.gmra.mxu0 %vm249_vm0, %v4406_v44  ;;  %s5238_s24 = scalar_lea.vmem %s3865_s10, 32  ;;  %p5245_p0 = scmp.lt.s32.totalorder %s3865_s10, %s5243_s25 }
 0x131   : > { %v4839_v6 = vpop.f32.mrf.mxu1  ;;  %5138 = vmatmul.mubr.msk.f32.gmra.mxu1 %vm249_vm0, %v4341_v30  ;;  %5190 = vmatprep.mubr.msk.f32.mxu0 %vm249_vm0, %v7284_v32  ;;  %p5239_p11 = scmp.ne.s32.totalorder %s3865_s10, %s5238_s24  ;;  %p5246_p1 = scmp.lt.s32.totalorder %s5244_s26, %s5238_s24 }
 0x132   : > { %v6418_v31 = vadd.f32 %v1208_v16, %v854_v52  ;;  %v869_v47 = vadd.f32 %v4839_v6, %v7282_v55  ;;  %5140 = vmatprep.mubr.msk.f32.mxu1 %vm249_vm0, %v7283_v57  ;;  %v1218_v49 = vpop.f32.mrf.mxu0  ;;  %v7291_v16 = vld [vmem:[#allocation15_spill] sm:$0xff] }
 0x133   : > { %v863_v14 = vpop.f32.mrf.mxu1  ;;  %p5240_p12 = pnand %p5239_p11, %p5359_p5  ;;  %p5247_p2 = por %p5246_p1, %p5245_p0 }
 0x134   : > { %v6427_v0 = vadd.f32 %v4889_v18, %v869_v47  ;;  %v864_v62 = vadd.f32 %v863_v14, %v7285_v51  ;;  %v4892_v23 = vpop.f32.mrf.mxu0  ;;  %5191 = vmatmul.mubr.msk.f32.gmra.mxu0 %vm249_vm0, %v7287_v34 }
 0x135   : > { %v4842_v33 = vpop.f32.mrf.mxu1  ;;  %5141 = vmatmul.mubr.msk.f32.gmra.mxu1 %vm249_vm0, %v7286_v60  ;;  %5193 = vmatprep.mubr.msk.f32.mxu0 %vm249_vm0, %v4409_v11  ;;  %p5241_p13 = pneg %p5240_p12 }
 0x136   : > { %v6434_v5 = vadd.f32 %v1218_v49, %v864_v62  ;;  %v879_v42 = vadd.f32 %v4842_v33, %v7288_v46  ;;  %5143 = vmatprep.mubr.msk.f32.mxu1 %vm249_vm0, %v4344_v21  ;;  %v1228_v56 = vpop.f32.mrf.mxu0 }
 0x137   : > { %v873_v1 = vpop.f32.mrf.mxu1  ;;  %p5248_p3 = pnand %p5247_p2, %p5241_p13 }
 0x138   : > { %v6441_v35 = vadd.f32 %v4892_v23, %v879_v42  ;;  %v874_v38 = vadd.f32 %v873_v1, %v7289_v8  ;;  %v4895_v27 = vpop.f32.mrf.mxu0  ;;  %5194 = vmatmul.mubr.msk.f32.gmra.mxu0 %vm249_vm0, %v4410_v28 }
 0x139   : > { %v4845_v37 = vpop.f32.mrf.mxu1  ;;  %5144 = vmatmul.mubr.msk.f32.gmra.mxu1 %vm249_vm0, %v4345_v58 }
 0x13a   : > { %v6446_v3 = vadd.f32 %v1228_v56, %v874_v38  ;;  %v889_v29 = vadd.f32 %v4845_v37, %v7290_v54  ;;  %v1238_v44 = vpop.f32.mrf.mxu0 }
 0x13b   : > { %v883_v30 = vpop.f32.mrf.mxu1 }
 0x13c   : > { %v6449_v9 = vadd.f32 %v4895_v27, %v889_v29  ;;  %v884_v17 = vadd.f32 %v883_v30, %v7291_v16  ;;  %v4950_v6 = vpop.f32.mrf.mxu0 }
 0x13d   : > { %v4900_v52 = vpop.f32.mrf.mxu1 }
 0x13e   : > { %v6452_v18 = vadd.f32 %v1238_v44, %v884_v17  ;;  %v1636_v55 = vadd.f32 %v4900_v52, %v6243_v39  ;;  %v1863_v57 = vpop.f32.mrf.mxu0 }
 0x13f   : > { %v1476_v47 = vpop.f32.mrf.mxu1 }
 0x140   : > { %v6455_v32 = vadd.f32 %v4950_v6, %v1636_v55  ;;  %v1635_v14 = vadd.f32 %v1476_v47, %v6250_v15  ;;  %v4953_v21 = vpop.f32.mrf.mxu0 }
 0x141   : > { %v4903_v49 = vpop.f32.mrf.mxu1 }
 0x142   : > { %v6458_v11 = vadd.f32 %v1863_v57, %v1635_v14  ;;  %v1638_v51 = vadd.f32 %v4903_v49, %v6257_v41  ;;  %v1873_v33 = vpop.f32.mrf.mxu0 }
 0x143   : > { %v1486_v62 = vpop.f32.mrf.mxu1 }
 0x144   : > { %v6461_v23 = vadd.f32 %v4953_v21, %v1638_v51  ;;  %v1637_v60 = vadd.f32 %v1486_v62, %v6264_v22  ;;  %v4956_v39 = vpop.f32.mrf.mxu0 }
 0x145   : > { %v4906_v34 = vpop.f32.mrf.mxu1 }
 0x146   : > { %v6464_v46 = vadd.f32 %v1873_v33, %v1637_v60  ;;  %v1640_v42 = vadd.f32 %v4906_v34, %v6272_v59  ;;  %v1883_v15 = vpop.f32.mrf.mxu0 }
 0x147   : > { %v1496_v58 = vpop.f32.mrf.mxu1 }
 0x148   : > { %v6467_v28 = vadd.f32 %v4956_v39, %v1640_v42  ;;  %v1639_v1 = vadd.f32 %v1496_v58, %v6279_v25  ;;  %v4959_v41 = vpop.f32.mrf.mxu0 }
 0x149   : > { %v4909_v56 = vpop.f32.mrf.mxu1 }
 0x14a   : > { %v6470_v8 = vadd.f32 %v1883_v15, %v1639_v1  ;;  %v1642_v38 = vadd.f32 %v4909_v56, %v6287_v4  ;;  %v1893_v22 = vpop.f32.mrf.mxu0 }
 0x14b   : > { %v1506_v37 = vpop.f32.mrf.mxu1 }
 0x14c   : > { %v6473_v27 = vadd.f32 %v4959_v41, %v1642_v38  ;;  %v1641_v54 = vadd.f32 %v1506_v37, %v6293_v2  ;;  %v4962_v59 = vpop.f32.mrf.mxu0 }
 0x14d   : > { %v4912_v29 = vpop.f32.mrf.mxu1 }
 0x14e   : > { %v6476_v30 = vadd.f32 %v1893_v22, %v1641_v54  ;;  %v1644_v44 = vadd.f32 %v4912_v29, %v6301_v20  ;;  %v1903_v25 = vpop.f32.mrf.mxu0 }
 0x14f   : > { %v1516_v16 = vpop.f32.mrf.mxu1 }
 0x150   : > { %v6479_v17 = vadd.f32 %v4962_v59, %v1644_v44  ;;  %v1643_v52 = vadd.f32 %v1516_v16, %v6307_v10  ;;  %v4965_v4 = vpop.f32.mrf.mxu0 }
 0x151   : > { %v4915_v6 = vpop.f32.mrf.mxu1 }
 0x152   : > { %v6482_v55 = vadd.f32 %v1903_v25, %v1643_v52  ;;  %v1646_v47 = vadd.f32 %v4915_v6, %v6315_v24  ;;  %v1913_v2 = vpop.f32.mrf.mxu0 }
 0x153   : > { %v1526_v57 = vpop.f32.mrf.mxu1 }
 0x154   : > { %v6485_v14 = vadd.f32 %v4965_v4, %v1646_v47  ;;  %v1645_v49 = vadd.f32 %v1526_v57, %v6321_v7  ;;  %v4968_v20 = vpop.f32.mrf.mxu0 }
 0x155   : > { %v4918_v21 = vpop.f32.mrf.mxu1 }
 0x156   : > { %v6488_v51 = vadd.f32 %v1913_v2, %v1645_v49  ;;  %v1648_v62 = vadd.f32 %v4918_v21, %v6329_v61  ;;  %v1923_v10 = vpop.f32.mrf.mxu0 }
 0x157   : > { %v1536_v33 = vpop.f32.mrf.mxu1 }
 0x158   : > { %v6491_v60 = vadd.f32 %v4968_v20, %v1648_v62  ;;  %v1647_v34 = vadd.f32 %v1536_v33, %v6335_v12  ;;  %v4971_v24 = vpop.f32.mrf.mxu0 }
 0x159   : > { %v4921_v39 = vpop.f32.mrf.mxu1 }
 0x15a   : > { %v6494_v42 = vadd.f32 %v1923_v10, %v1647_v34  ;;  %v1650_v58 = vadd.f32 %v4921_v39, %v6343_v13  ;;  %v1933_v7 = vpop.f32.mrf.mxu0 }
 0x15b   : > { %v1546_v15 = vpop.f32.mrf.mxu1 }
 0x15c   : > { %v6497_v1 = vadd.f32 %v4971_v24, %v1650_v58  ;;  %v1649_v56 = vadd.f32 %v1546_v15, %v6349_v40  ;;  %v4974_v61 = vpop.f32.mrf.mxu0 }
 0x15d   : > { %v4924_v41 = vpop.f32.mrf.mxu1 }
 0x15e   : > { %v6500_v38 = vadd.f32 %v1933_v7, %v1649_v56  ;;  %v1652_v37 = vadd.f32 %v4924_v41, %v6357_v19  ;;  %v1943_v12 = vpop.f32.mrf.mxu0 }
 0x15f   : > { %v1556_v22 = vpop.f32.mrf.mxu1 }
 0x160   : > { %v6503_v54 = vadd.f32 %v4974_v61, %v1652_v37  ;;  %v1651_v29 = vadd.f32 %v1556_v22, %v6363_v43  ;;  %v4977_v13 = vpop.f32.mrf.mxu0 }
 0x161   : > { %v4927_v59 = vpop.f32.mrf.mxu1 }
 0x162   : > { %v6506_v44 = vadd.f32 %v1943_v12, %v1651_v29  ;;  %v1654_v16 = vadd.f32 %v4927_v59, %v6371_v48  ;;  %v1953_v40 = vpop.f32.mrf.mxu0 }
 0x163   : > { %v1566_v25 = vpop.f32.mrf.mxu1 }
 0x164   : > { %v6509_v52 = vadd.f32 %v4977_v13, %v1654_v16  ;;  %v1653_v6 = vadd.f32 %v1566_v25, %v6377_v53  ;;  %v4980_v19 = vpop.f32.mrf.mxu0 }
 0x165   : > { %v4930_v4 = vpop.f32.mrf.mxu1 }
 0x166   : > { %7292 = vst [vmem:[#allocation16_spill] sm:$0xff] %v6509_v52  ;;  %v6512_v47 = vadd.f32 %v1953_v40, %v1653_v6  ;;  %v1656_v57 = vadd.f32 %v4930_v4, %v6385_v26  ;;  %v1963_v43 = vpop.f32.mrf.mxu0 }
 0x167   : > { %v1576_v2 = vpop.f32.mrf.mxu1 }
 0x168   : > { %7293 = vst [vmem:[#allocation17_spill] sm:$0xff] %v6512_v47  ;;  %v6515_v49 = vadd.f32 %v4980_v19, %v1656_v57  ;;  %v1655_v21 = vadd.f32 %v1576_v2, %v6391_v63  ;;  %v4983_v48 = vpop.f32.mrf.mxu0 }
 0x169   : > { %v4933_v20 = vpop.f32.mrf.mxu1 }
 0x16a   : > { %7294 = vst [vmem:[#allocation18_spill] sm:$0xff] %v6515_v49  ;;  %v6518_v62 = vadd.f32 %v1963_v43, %v1655_v21  ;;  %v1658_v33 = vadd.f32 %v4933_v20, %v6400_v36  ;;  %v1973_v53 = vpop.f32.mrf.mxu0 }
 0x16b   : > { %v1586_v10 = vpop.f32.mrf.mxu1 }
 0x16c   : > { %7295 = vst [vmem:[#allocation19_spill] sm:$0xff] %v6518_v62  ;;  %v6521_v34 = vadd.f32 %v4983_v48, %v1658_v33  ;;  %v1657_v39 = vadd.f32 %v1586_v10, %v6406_v50  ;;  %v4986_v26 = vpop.f32.mrf.mxu0 }
 0x16d   : > { %v4936_v24 = vpop.f32.mrf.mxu1 }
 0x16e   : > { %7296 = vst [vmem:[#allocation20_spill] sm:$0xff] %v6521_v34  ;;  %v6524_v58 = vadd.f32 %v1973_v53, %v1657_v39  ;;  %v1660_v15 = vadd.f32 %v4936_v24, %v6413_v45  ;;  %v1983_v63 = vpop.f32.mrf.mxu0 }
 0x16f   : > { %v1596_v7 = vpop.f32.mrf.mxu1 }
 0x170   : > { %7297 = vst [vmem:[#allocation21_spill] sm:$0xff] %v6524_v58  ;;  %v6527_v56 = vadd.f32 %v4986_v26, %v1660_v15  ;;  %v1659_v41 = vadd.f32 %v1596_v7, %v6418_v31  ;;  %v4989_v36 = vpop.f32.mrf.mxu0 }
 0x171   : > { %v4939_v61 = vpop.f32.mrf.mxu1 }
 0x172   : > { %7298 = vst [vmem:[#allocation22_spill] sm:$0xff] %v6527_v56  ;;  %v6530_v37 = vadd.f32 %v1983_v63, %v1659_v41  ;;  %v1662_v22 = vadd.f32 %v4939_v61, %v6427_v0  ;;  %v1993_v50 = vpop.f32.mrf.mxu0 }
 0x173   : > { %v1606_v12 = vpop.f32.mrf.mxu1 }
 0x174   : > { %7299 = vst [vmem:[#allocation23_spill] sm:$0xff] %v6530_v37  ;;  %v6533_v29 = vadd.f32 %v4989_v36, %v1662_v22  ;;  %v1661_v59 = vadd.f32 %v1606_v12, %v6434_v5  ;;  %v4992_v45 = vpop.f32.mrf.mxu0 }
 0x175   : > { %v4942_v13 = vpop.f32.mrf.mxu1 }
 0x176   : > { %7300 = vst [vmem:[#allocation24_spill] sm:$0xff] %v6533_v29  ;;  %v6536_v16 = vadd.f32 %v1993_v50, %v1661_v59  ;;  %v1664_v25 = vadd.f32 %v4942_v13, %v6441_v35  ;;  %v2003_v31 = vpop.f32.mrf.mxu0 }
 0x177   : > { %v1616_v40 = vpop.f32.mrf.mxu1 }
 0x178   : > { %7301 = vst [vmem:[#allocation25_spill] sm:$0xff] %v6536_v16  ;;  %v6539_v6 = vadd.f32 %v4992_v45, %v1664_v25  ;;  %v1663_v4 = vadd.f32 %v1616_v40, %v6446_v3  ;;  %v4995_v0 = vpop.f32.mrf.mxu0 }
 0x179   : > { %v4945_v19 = vpop.f32.mrf.mxu1 }
 0x17a   : > { %7302 = vst [vmem:[#allocation26_spill] sm:$0xff] %v6539_v6  ;;  %v6542_v57 = vadd.f32 %v2003_v31, %v1663_v4  ;;  %v1666_v2 = vadd.f32 %v4945_v19, %v6449_v9  ;;  %v2013_v5 = vpop.f32.mrf.mxu0 }
 0x17b   : > { %v1626_v43 = vpop.f32.mrf.mxu1 }
 0x17c   : > { %7303 = vst [vmem:[#allocation27_spill] sm:$0xff] %v6542_v57  ;;  %v6545_v21 = vadd.f32 %v4995_v0, %v1666_v2  ;;  %v1665_v20 = vadd.f32 %v1626_v43, %v6452_v18  ;;  %v6548_v35 = vpop.f32.mrf.mxu0 }
 0x17d   : > { %v5000_v48 = vpop.f32.mrf.mxu1 }
 0x17e   : > { %7304 = vst [vmem:[#allocation28_spill] sm:$0xff] %v6545_v21  ;;  %v6550_v33 = vadd.f32 %v2013_v5, %v1665_v20  ;;  %v6552_v53 = vpop.f32.mrf.mxu0 }
 0x17f   : > { %v2250_v10 = vpop.f32.mrf.mxu1 }
 0x180   : > { %7305 = vst [vmem:[#allocation29_spill] sm:$0xff] %v6550_v33  ;;  %v6556_v39 = vpop.f32.mrf.mxu0 }
 0x181   : > { %v6554_v3 = vpop.f32.mrf.mxu1 }
 0x182   : > { %v6560_v9 = vpop.f32.mrf.mxu0 }
 0x183   : > { %v6558_v24 = vpop.f32.mrf.mxu1 }
 0x184   : > { %v6564_v15 = vpop.f32.mrf.mxu0 }
 0x185   : > { %v6562_v26 = vpop.f32.mrf.mxu1 }
 0x186   : > { %v6568_v7 = vpop.f32.mrf.mxu0 }
 0x187   : > { %v6566_v18 = vpop.f32.mrf.mxu1 }
 0x188   : > { %v6572_v41 = vpop.f32.mrf.mxu0 }
 0x189   : > { %v6570_v63 = vpop.f32.mrf.mxu1 }
 0x18a   : > { %v6576_v36 = vpop.f32.mrf.mxu0 }
 0x18b   : > { %v6574_v61 = vpop.f32.mrf.mxu1 }
 0x18c   : > { %v6580_v12 = vpop.f32.mrf.mxu0 }
 0x18d   : > { %v6578_v22 = vpop.f32.mrf.mxu1 }
 0x18e   : > { %v6584_v59 = vpop.f32.mrf.mxu0 }
 0x18f   : > { %v6582_v50 = vpop.f32.mrf.mxu1 }
 0x190   : > { %v6588_v45 = vpop.f32.mrf.mxu0 }
 0x191   : > { %v6586_v13 = vpop.f32.mrf.mxu1 }
 0x192   : > { %v6592_v40 = vpop.f32.mrf.mxu0 }
 0x193   : > { %v6590_v25 = vpop.f32.mrf.mxu1 }
 0x194   : > { %v6596_v4 = vpop.f32.mrf.mxu0 }
 0x195   : > { %v6594_v31 = vpop.f32.mrf.mxu1 }
 0x196   : > { %v6600_v0 = vpop.f32.mrf.mxu0 }
 0x197   : > { %v6598_v19 = vpop.f32.mrf.mxu1 }
 0x198   : > { %v6604_v43 = vpop.f32.mrf.mxu0 }
 0x199   : > { %v6602_v2 = vpop.f32.mrf.mxu1 }
 0x19a   : > { %v6608_v20 = vpop.f32.mrf.mxu0 }
 0x19b   : > { %v6606_v5 = vpop.f32.mrf.mxu1 }
 0x19c   : > { %v6612_v21 = vpop.f32.mrf.mxu0 }
 0x19d   : > { %v6610_v33 = vpop.f32.mrf.mxu1 }
 0x19e   : > { %v6616_v6 = vpop.f32.mrf.mxu0 }
 0x19f   : > { %v6614_v57 = vpop.f32.mrf.mxu1  ;;  %7306 = vst [vmem:[#allocation30_spill] sm:$0xff] %v6616_v6 }
 0x1a0   : > { %v6620_v29 = vpop.f32.mrf.mxu0 }
 0x1a1   : > { %v6618_v16 = vpop.f32.mrf.mxu1  ;;  %7308 = vst [vmem:[#allocation32_spill] sm:$0xff] %v6620_v29 }
 0x1a2   : > { %7307 = vst [vmem:[#allocation31_spill] sm:$0xff] %v6618_v16  ;;  %v6624_v56 = vpop.f32.mrf.mxu0 }
 0x1a3   : > { %v6622_v37 = vpop.f32.mrf.mxu1  ;;  %7310 = vst [vmem:[#allocation35_spill] sm:$0xff] %v6624_v56 }
 0x1a4   : > { %7309 = vst [vmem:[#allocation34_spill] sm:$0xff] %v6622_v37  ;;  %v6628_v34 = vpop.f32.mrf.mxu0 }
 0x1a5   : > { %v6626_v58 = vpop.f32.mrf.mxu1  ;;  %7312 = vst [vmem:[#allocation6_spill] sm:$0xff] %v6628_v34 }
 0x1a6   : > { %7311 = vst [vmem:[#allocation33_spill] sm:$0xff] %v6626_v58  ;;  %v6632_v49 = vpop.f32.mrf.mxu0 }
 0x1a7   : > { %v6630_v62 = vpop.f32.mrf.mxu1  ;;  %7314 = vst [vmem:[#allocation8_spill] sm:$0xff] %v6632_v49 }
 0x1a8   : > { %7313 = vst [vmem:[#allocation7_spill] sm:$0xff] %v6630_v62  ;;  %v6636_v52 = vpop.f32.mrf.mxu0 }
 0x1a9   : > { %v6634_v47 = vpop.f32.mrf.mxu1  ;;  %7316 = vst [vmem:[#allocation10_spill] sm:$0xff] %v6636_v52 }
 0x1aa   : > { %7315 = vst [vmem:[#allocation36_spill] sm:$0xff] %v6634_v47  ;;  %v6640_v16 = vpop.f32.mrf.mxu0 }
 0x1ab   : > { %v6638_v6 = vpop.f32.mrf.mxu1  ;;  %7318 = vst [vmem:[#allocation5_spill] sm:$0xff] %v6640_v16 }
 0x1ac   : > { %7317 = vst [vmem:[#allocation9_spill] sm:$0xff] %v6638_v6  ;;  %v6644_v37 = vpop.f32.mrf.mxu0 }
 0x1ad   : > { %v6642_v29 = vpop.f32.mrf.mxu1  ;;  %7320 = vst [vmem:[#allocation11_spill] sm:$0xff] %v6644_v37 }
 0x1ae   : > { %7319 = vst [vmem:[#allocation12_spill] sm:$0xff] %v6642_v29  ;;  %v6648_v58 = vpop.f32.mrf.mxu0 }
 0x1af   : > { %v6646_v56 = vpop.f32.mrf.mxu1  ;;  %7322 = vst [vmem:[#allocation14_spill] sm:$0xff] %v6648_v58 }
 0x1b0   : > { %7321 = vst [vmem:[#allocation13_spill] sm:$0xff] %v6646_v56  ;;  %v6652_v49 = vpop.f32.mrf.mxu0  ;;  %v2410_v56 = vadd.f32 %v5000_v48, %v6455_v32  ;;  %v2411_v48 = vadd.f32 %v6558_v24, %v6464_v46  ;;  %v2413_v46 = vadd.f32 %v6566_v18, %v6470_v8 }
 0x1b1   : > { %v6650_v34 = vpop.f32.mrf.mxu1  ;;  %7324 = vst [vmem:[#allocation37_spill] sm:$0xff] %v6652_v49  ;;  %v2409_v49 = vadd.f32 %v2250_v10, %v6458_v11  ;;  %v2414_v11 = vadd.f32 %v6562_v26, %v6467_v28 }
 0x1b2   : > { %7323 = vst [vmem:[#allocation15_spill] sm:$0xff] %v6650_v34  ;;  %v6656_v52 = vpop.f32.mrf.mxu0  ;;  %v2799_v28 = vadd.f32 %v6560_v9, %v2411_v48  ;;  %v2801_v26 = vadd.f32 %v6568_v7, %v2413_v46  ;;  %v2417_v46 = vadd.f32 %v6582_v50, %v6482_v55  ;;  %v2420_v50 = vadd.f32 %v6586_v13, %v6485_v14 }
 0x1b3   : > { %v6654_v47 = vpop.f32.mrf.mxu1  ;;  %7326 = vst [vmem:[#allocation39_spill] sm:$0xff] %v6656_v52  ;;  %v2798_v52 = vadd.f32 %v6548_v35, %v2410_v56  ;;  %v2797_v32 = vadd.f32 %v6552_v53, %v2409_v49  ;;  %v2802_v24 = vadd.f32 %v6564_v15, %v2414_v11  ;;  %v2415_v15 = vadd.f32 %v6574_v61, %v6476_v30 }
 0x1b4   : > { %7325 = vst [vmem:[#allocation38_spill] sm:$0xff] %v6654_v47  ;;  %v6660_v16 = vpop.f32.mrf.mxu0  ;;  %v2418_v11 = vadd.f32 %v6578_v22, %v6479_v17 }
 0x1b5   : > { %v6658_v6 = vpop.f32.mrf.mxu1  ;;  %7327 = vst [vmem:[#allocation40_spill] sm:$0xff] %v6660_v16  ;;  %v2412_v16 = vadd.f32 %v6554_v3, %v6461_v23 }
 0x1b6   : > { %v6664_v37 = vpop.f32.mrf.mxu0 }
 0x1b7   : > { %v6662_v29 = vpop.f32.mrf.mxu1  ;;  %7329 = vst [vmem:[#allocation42_spill] sm:$0xff] %v6664_v37  ;;  %v2800_v35 = vadd.f32 %v6556_v39, %v2412_v16 }
 0x1b8   : > { %7328 = vst [vmem:[#allocation41_spill] sm:$0xff] %v6662_v29  ;;  %v6669_v34 = vpop.f32.mrf.mxu0 }
 0x1b9   : > { %v6667_v58 = vpop.f32.mrf.mxu1  ;;  %7330 = vst [vmem:[#allocation43_spill] sm:$0xff] %v6669_v34 }
 0x1ba   : > { %v6674_v47 = vpop.f32.mrf.mxu0 }
 0x1bb   : > { %v6672_v62 = vpop.f32.mrf.mxu1 }
 0x1bc   : > { %v5150_v37 = vpop.f32.mrf.mxu0 }
 0x1bd   : > { %v5100_v29 = vpop.f32.mrf.mxu1 }
 0x1be   : > { %v3185_v34 = vadd.f32 %v5100_v29, %v2798_v52  ;;  %v3412_v23 = vpop.f32.mrf.mxu0 }
 0x1bf   : > { %v3025_v56 = vpop.f32.mrf.mxu1 }
 0x1c0   : > { %v6691_v10 = vadd.f32 %v5150_v37, %v3185_v34  ;;  %v3184_v49 = vadd.f32 %v3025_v56, %v2797_v32  ;;  %v5153_v29 = vpop.f32.mrf.mxu0  ;;  %v2416_v37 = vadd.f32 %v6570_v63, %v6473_v27 }
 0x1c1   : > { %v5103_v52 = vpop.f32.mrf.mxu1 }
 0x1c2   : > { %3604 = vst.msk [vmem:[%s6688_s6 + $0x8] sm:$0xff] %vm249_vm0, %v6691_v10  ;;  %v6699_v53 = vadd.f32 %v3412_v23, %v3184_v49  ;;  %v3187_v3 = vadd.f32 %v5103_v52, %v2800_v35  ;;  %v3422_v34 = vpop.f32.mrf.mxu0  ;;  %v3636_v27 = vsel %vm249_vm0, %v6691_v10, 0.0  ;;  %v2804_v35 = vadd.f32 %v6572_v41, %v2416_v37 }
 0x1c3   : > { %v3035_v16 = vpop.f32.mrf.mxu1 }
 0x1c4   : > { %3603 = vst.msk [vmem:[%s6688_s6] sm:$0xff] %vm249_vm0, %v6699_v53  ;;  %v3635_v8 = vsel %vm249_vm0, %v6699_v53, 0.0  ;;  %v6709_v39 = vadd.f32 %v5153_v29, %v3187_v3  ;;  %v3186_v9 = vadd.f32 %v3035_v16, %v2799_v28  ;;  %v5156_v32 = vpop.f32.mrf.mxu0  ;;  %v2803_v29 = vadd.f32 %v6576_v36, %v2415_v15 }
 0x1c5   : > { %v5106_v18 = vpop.f32.mrf.mxu1  ;;  %v3637_v56 = vadd.f32 %v3636_v27, %v3635_v8  ;;  %v2422_v27 = vadd.f32 %v6594_v31, %v6491_v60 }
 0x1c6   : > { %3606 = vst.msk [vmem:[%s6688_s6 + $0x18] sm:$0xff] %vm249_vm0, %v6709_v39  ;;  %v6719_v63 = vadd.f32 %v3422_v34, %v3186_v9  ;;  %v3189_v48 = vadd.f32 %v5106_v18, %v2802_v24  ;;  %v3432_v23 = vpop.f32.mrf.mxu0  ;;  %v3640_v41 = vsel %vm249_vm0, %v6709_v39, 0.0  ;;  %v2806_v24 = vadd.f32 %v6580_v12, %v2418_v11 }
 0x1c7   : > { %v3045_v7 = vpop.f32.mrf.mxu1  ;;  %v2805_v9 = vadd.f32 %v6584_v59, %v2417_v46 }
 0x1c8   : > { %3605 = vst.msk [vmem:[%s6688_s6 + $0x10] sm:$0xff] %vm249_vm0, %v6719_v63  ;;  %v3638_v30 = vsel %vm249_vm0, %v6719_v63, 0.0  ;;  %v6729_v61 = vadd.f32 %v5156_v32, %v3189_v48  ;;  %v3188_v49 = vadd.f32 %v3045_v7, %v2801_v26  ;;  %v5159_v22 = vpop.f32.mrf.mxu0  ;;  %v2419_v32 = vadd.f32 %v6590_v25, %v6488_v51 }
 0x1c9   : > { %v3639_v52 = vadd.f32 %v3638_v30, %v3637_v56  ;;  %v5109_v17 = vpop.f32.mrf.mxu1  ;;  %v2808_v56 = vadd.f32 %v6588_v45, %v2420_v50  ;;  %v2426_v50 = vadd.f32 %v6610_v33, %v6503_v54 }
 0x1ca   : > { %3608 = vst.msk [vmem:[%s6688_s6 + $0x28] sm:$0xff] %vm249_vm0, %v6729_v61  ;;  %v6739_v28 = vadd.f32 %v3432_v23, %v3188_v49  ;;  %v3191_v3 = vadd.f32 %v5109_v17, %v2804_v35  ;;  %v3442_v55 = vpop.f32.mrf.mxu0  ;;  %v3644_v14 = vsel %vm249_vm0, %v6729_v61, 0.0  ;;  %v2421_v23 = vadd.f32 %v6598_v19, %v6494_v42 }
 0x1cb   : > { %v3641_v16 = vadd.f32 %v3640_v41, %v3639_v52  ;;  %v3055_v34 = vpop.f32.mrf.mxu1  ;;  %v2807_v30 = vadd.f32 %v6592_v40, %v2419_v32  ;;  %v2810_v52 = vadd.f32 %v6596_v4, %v2422_v27  ;;  %v2424_v19 = vadd.f32 %v6602_v2, %v6497_v1 }
 0x1cc   : > { %3607 = vst.msk [vmem:[%s6688_s6 + $0x20] sm:$0xff] %vm249_vm0, %v6739_v28  ;;  %v3642_v36 = vsel %vm249_vm0, %v6739_v28, 0.0  ;;  %v6749_v37 = vadd.f32 %v5159_v22, %v3191_v3  ;;  %v3190_v8 = vadd.f32 %v3055_v34, %v2803_v29  ;;  %v5162_v18 = vpop.f32.mrf.mxu0  ;;  %v2809_v3 = vadd.f32 %v6600_v0, %v2421_v23  ;;  %v7333_v23 = vld [vmem:[#allocation30_spill] sm:$0xff] }
 0x1cd   : > { %v3643_v26 = vadd.f32 %v3642_v36, %v3641_v16  ;;  %v5112_v12 = vpop.f32.mrf.mxu1  ;;  %v2423_v34 = vadd.f32 %v6606_v5, %v6500_v38  ;;  %v2814_v27 = vadd.f32 %v6612_v21, %v2426_v50  ;;  %v7339_v50 = vld [vmem:[#allocation19_spill] sm:$0xff] }
 0x1ce   : > { %3610 = vst.msk [vmem:[%s6688_s6 + $0x38] sm:$0xff] %vm249_vm0, %v6749_v37  ;;  %v6759_v13 = vadd.f32 %v3442_v55, %v3190_v8  ;;  %v3193_v15 = vadd.f32 %v5112_v12, %v2806_v24  ;;  %v3452_v11 = vpop.f32.mrf.mxu0  ;;  %v3648_v45 = vsel %vm249_vm0, %v6749_v37, 0.0  ;;  %v2425_v12 = vadd.f32 %v6614_v57, %v6506_v44  ;;  %v7331_v57 = vld [vmem:[#allocation16_spill] sm:$0xff] }
 0x1cf   : > { %v3645_v59 = vadd.f32 %v3644_v14, %v3643_v26  ;;  %v3065_v48 = vpop.f32.mrf.mxu1  ;;  %v2811_v32 = vadd.f32 %v6608_v20, %v2423_v34 }
 0x1d0   : > { %3609 = vst.msk [vmem:[%s6688_s6 + $0x30] sm:$0xff] %vm249_vm0, %v6759_v13  ;;  %v3646_v51 = vsel %vm249_vm0, %v6759_v13, 0.0  ;;  %v6769_v25 = vadd.f32 %v5162_v18, %v3193_v15  ;;  %v3192_v7 = vadd.f32 %v3065_v48, %v2805_v9  ;;  %v5165_v31 = vpop.f32.mrf.mxu0  ;;  %v2812_v9 = vadd.f32 %v6604_v43, %v2424_v19  ;;  %v7337_v19 = vld [vmem:[#allocation33_spill] sm:$0xff] }
 0x1d1   : > { %v3647_v35 = vadd.f32 %v3646_v51, %v3645_v59  ;;  %v5115_v60 = vpop.f32.mrf.mxu1 }
 0x1d2   : > { %3612 = vst.msk [vmem:[%s6688_s6 + $0x48] sm:$0xff] %vm249_vm0, %v6769_v25  ;;  %v6779_v49 = vadd.f32 %v3452_v11, %v3192_v7  ;;  %v3195_v46 = vadd.f32 %v5115_v60, %v2808_v56  ;;  %v3462_v42 = vpop.f32.mrf.mxu0  ;;  %v3652_v1 = vsel %vm249_vm0, %v6769_v25, 0.0  ;;  %v7332_v11 = vld [vmem:[#allocation31_spill] sm:$0xff] }
 0x1d3   : > { %v3649_v17 = vadd.f32 %v3648_v45, %v3647_v35  ;;  %v3075_v22 = vpop.f32.mrf.mxu1  ;;  %v2428_v56 = vadd.f32 %v7332_v11, %v7331_v57  ;;  %v2813_v35 = vadd.f32 %v7333_v23, %v2425_v12  ;;  %v7335_v45 = vld [vmem:[#allocation34_spill] sm:$0xff] }
 0x1d4   : > { %3611 = vst.msk [vmem:[%s6688_s6 + $0x40] sm:$0xff] %vm249_vm0, %v6779_v49  ;;  %v3650_v40 = vsel %vm249_vm0, %v6779_v49, 0.0  ;;  %v6789_v29 = vadd.f32 %v5165_v31, %v3195_v46  ;;  %v3194_v41 = vadd.f32 %v3075_v22, %v2807_v30  ;;  %v5168_v16 = vpop.f32.mrf.mxu0  ;;  %v7334_v30 = vld [vmem:[#allocation17_spill] sm:$0xff] }
 0x1d5   : > { %v3651_v24 = vadd.f32 %v3650_v40, %v3649_v17  ;;  %v5118_v4 = vpop.f32.mrf.mxu1  ;;  %v2427_v46 = vadd.f32 %v7335_v45, %v7334_v30  ;;  %v7347_v30 = vld [vmem:[#allocation9_spill] sm:$0xff] }
 0x1d6   : > { %3614 = vst.msk [vmem:[%s6688_s6 + $0x58] sm:$0xff] %vm249_vm0, %v6789_v29  ;;  %v6799_v2 = vadd.f32 %v3462_v42, %v3194_v41  ;;  %v3197_v55 = vadd.f32 %v5118_v4, %v2810_v52  ;;  %v3472_v8 = vpop.f32.mrf.mxu0  ;;  %v3656_v43 = vsel %vm249_vm0, %v6789_v29, 0.0  ;;  %v7336_v42 = vld [vmem:[#allocation18_spill] sm:$0xff]  ;;  %v7338_v4 = vld [vmem:[#allocation32_spill] sm:$0xff] }
 0x1d7   : > { %v3653_v0 = vadd.f32 %v3652_v1, %v3651_v24  ;;  %v3085_v36 = vpop.f32.mrf.mxu1  ;;  %v2430_v40 = vadd.f32 %v7337_v19, %v7336_v42  ;;  %v7348_v42 = vld [vmem:[#allocation22_spill] sm:$0xff]  ;;  %v7349_v19 = vld [vmem:[#allocation12_spill] sm:$0xff] }
 0x1d8   : > { %3613 = vst.msk [vmem:[%s6688_s6 + $0x50] sm:$0xff] %vm249_vm0, %v6799_v2  ;;  %v3654_v38 = vsel %vm249_vm0, %v6799_v2, 0.0  ;;  %v6809_v5 = vadd.f32 %v5168_v16, %v3197_v55  ;;  %v3196_v26 = vadd.f32 %v3085_v36, %v2809_v3  ;;  %v5171_v33 = vpop.f32.mrf.mxu0  ;;  %v2816_v16 = vadd.f32 %v7338_v4, %v2428_v56  ;;  %v7350_v4 = vld [vmem:[#allocation10_spill] sm:$0xff] }
 0x1d9   : > { %v3655_v18 = vadd.f32 %v3654_v38, %v3653_v0  ;;  %v5121_v54 = vpop.f32.mrf.mxu1  ;;  %v7340_v0 = vld [vmem:[#allocation7_spill] sm:$0xff] }
 0x1da   : > { %3616 = vst.msk [vmem:[%s6688_s6 + $0x68] sm:$0xff] %vm249_vm0, %v6809_v5  ;;  %v6819_v14 = vadd.f32 %v3472_v8, %v3196_v26  ;;  %v3199_v15 = vadd.f32 %v5121_v54, %v2812_v9  ;;  %v3482_v44 = vpop.f32.mrf.mxu0  ;;  %v3660_v52 = vsel %vm249_vm0, %v6809_v5, 0.0  ;;  %v2429_v36 = vadd.f32 %v7340_v0, %v7339_v50  ;;  %v7341_v26 = vld [vmem:[#allocation35_spill] sm:$0xff] }
 0x1db   : > { %v3657_v59 = vadd.f32 %v3656_v43, %v3655_v18  ;;  %v3095_v48 = vpop.f32.mrf.mxu1  ;;  %v2815_v12 = vadd.f32 %v7341_v26, %v2427_v46  ;;  %v7351_v0 = vld [vmem:[#allocation23_spill] sm:$0xff] }
 0x1dc   : > { %3615 = vst.msk [vmem:[%s6688_s6 + $0x60] sm:$0xff] %vm249_vm0, %v6819_v14  ;;  %v3658_v20 = vsel %vm249_vm0, %v6819_v14, 0.0  ;;  %v6829_v51 = vadd.f32 %v5171_v33, %v3199_v15  ;;  %v3198_v7 = vadd.f32 %v3095_v48, %v2811_v32  ;;  %v5174_v31 = vpop.f32.mrf.mxu0  ;;  %v7342_v32 = vld [vmem:[#allocation6_spill] sm:$0xff]  ;;  %v7343_v48 = vld [vmem:[#allocation20_spill] sm:$0xff] }
 0x1dd   : > { %v3659_v60 = vadd.f32 %v3658_v20, %v3657_v59  ;;  %v5124_v21 = vpop.f32.mrf.mxu1  ;;  %v2818_v43 = vadd.f32 %v7342_v32, %v2430_v40  ;;  %v2434_v40 = vadd.f32 %v7349_v19, %v7348_v42 }
 0x1de   : > { %3618 = vst.msk [vmem:[%s6688_s6 + $0x78] sm:$0xff] %vm249_vm0, %v6829_v51  ;;  %v6839_v17 = vadd.f32 %v3482_v44, %v3198_v7  ;;  %v3201_v22 = vadd.f32 %v5124_v21, %v2814_v27  ;;  %v3492_v24 = vpop.f32.mrf.mxu0  ;;  %v3664_v18 = vsel %vm249_vm0, %v6829_v51, 0.0  ;;  %v7344_v44 = vld [vmem:[#allocation36_spill] sm:$0xff] }
 0x1df   : > { %v3661_v41 = vadd.f32 %v3660_v52, %v3659_v60  ;;  %v3105_v3 = vpop.f32.mrf.mxu1  ;;  %v2432_v57 = vadd.f32 %v7344_v44, %v7343_v48  ;;  %v7345_v7 = vld [vmem:[#allocation8_spill] sm:$0xff] }
 0x1e0   : > { %3617 = vst.msk [vmem:[%s6688_s6 + $0x70] sm:$0xff] %vm249_vm0, %v6839_v17  ;;  %v3662_v34 = vsel %vm249_vm0, %v6839_v17, 0.0  ;;  %v6849_v1 = vadd.f32 %v5174_v31, %v3201_v22  ;;  %v3200_v55 = vadd.f32 %v3105_v3, %v2813_v35  ;;  %v5177_v38 = vpop.f32.mrf.mxu0  ;;  %v2817_v23 = vadd.f32 %v7345_v7, %v2429_v36  ;;  %v7346_v31 = vld [vmem:[#allocation21_spill] sm:$0xff] }
 0x1e1   : > { %v3663_v8 = vadd.f32 %v3662_v34, %v3661_v41  ;;  %v5127_v9 = vpop.f32.mrf.mxu1  ;;  %v2431_v45 = vadd.f32 %v7347_v30, %v7346_v31  ;;  %v7352_v36 = vld [vmem:[#allocation13_spill] sm:$0xff] }
 0x1e2   : > { %3620 = vst.msk [vmem:[%s6688_s6 + $0x88] sm:$0xff] %vm249_vm0, %v6849_v1  ;;  %v6859_v54 = vadd.f32 %v3492_v24, %v3200_v55  ;;  %v3203_v33 = vadd.f32 %v5127_v9, %v2816_v16  ;;  %v3502_v59 = vpop.f32.mrf.mxu0  ;;  %v3668_v46 = vsel %vm249_vm0, %v6849_v1, 0.0  ;;  %v2820_v16 = vadd.f32 %v7350_v4, %v2432_v57  ;;  %v7355_v57 = vld [vmem:[#allocation24_spill] sm:$0xff] }
 0x1e3   : > { %v3665_v15 = vadd.f32 %v3664_v18, %v3663_v8  ;;  %v3115_v27 = vpop.f32.mrf.mxu1  ;;  %v2433_v8 = vadd.f32 %v7352_v36, %v7351_v0 }
 0x1e4   : > { %3619 = vst.msk [vmem:[%s6688_s6 + $0x80] sm:$0xff] %vm249_vm0, %v6859_v54  ;;  %v3666_v11 = vsel %vm249_vm0, %v6859_v54, 0.0  ;;  %v6869_v56 = vadd.f32 %v5177_v38, %v3203_v33  ;;  %v3202_v20 = vadd.f32 %v3115_v27, %v2815_v12  ;;  %v5180_v21 = vpop.f32.mrf.mxu0  ;;  %v7353_v12 = vld [vmem:[#allocation5_spill] sm:$0xff] }
 0x1e5   : > { %v3667_v35 = vadd.f32 %v3666_v11, %v3665_v15  ;;  %v5130_v60 = vpop.f32.mrf.mxu1  ;;  %v2819_v18 = vadd.f32 %v7353_v12, %v2431_v45  ;;  %v7354_v15 = vld [vmem:[#allocation11_spill] sm:$0xff] }
 0x1e6   : > { %3622 = vst.msk [vmem:[%s6688_s6 + $0x98] sm:$0xff] %vm249_vm0, %v6869_v56  ;;  %v6879_v52 = vadd.f32 %v3502_v59, %v3202_v20  ;;  %v3205_v22 = vadd.f32 %v5130_v60, %v2818_v43  ;;  %v3512_v24 = vpop.f32.mrf.mxu0  ;;  %v3672_v33 = vsel %vm249_vm0, %v6869_v56, 0.0  ;;  %v2822_v27 = vadd.f32 %v7354_v15, %v2434_v40  ;;  %v7356_v11 = vld [vmem:[#allocation15_spill] sm:$0xff]  ;;  %v7357_v60 = vld [vmem:[#allocation14_spill] sm:$0xff] }
 0x1e7   : > { %v3669_v41 = vadd.f32 %v3668_v46, %v3667_v35  ;;  %v3125_v3 = vpop.f32.mrf.mxu1  ;;  %v2436_v20 = vadd.f32 %v7356_v11, %v7355_v57  ;;  %v7358_v46 = vld [vmem:[#allocation25_spill] sm:$0xff] }
 0x1e8   : > { %3621 = vst.msk [vmem:[%s6688_s6 + $0x90] sm:$0xff] %vm249_vm0, %v6879_v52  ;;  %v3670_v34 = vsel %vm249_vm0, %v6879_v52, 0.0  ;;  %v6889_v55 = vadd.f32 %v5180_v21, %v3205_v22  ;;  %v3204_v50 = vadd.f32 %v3125_v3, %v2817_v23  ;;  %v5183_v26 = vpop.f32.mrf.mxu0  ;;  %v2821_v21 = vadd.f32 %v7357_v60, %v2433_v8  ;;  %v7359_v22 = vld [vmem:[#allocation38_spill] sm:$0xff] }
 0x1e9   : > { %v3671_v9 = vadd.f32 %v3670_v34, %v3669_v41  ;;  %v5133_v38 = vpop.f32.mrf.mxu1  ;;  %v2435_v42 = vadd.f32 %v7359_v22, %v7358_v46  ;;  %v7360_v3 = vld [vmem:[#allocation26_spill] sm:$0xff] }
 0x1ea   : > { %3624 = vst.msk [vmem:[%s6688_s6 + $0xa8] sm:$0xff] %vm249_vm0, %v6889_v55  ;;  %v6899_v32 = vadd.f32 %v3512_v24, %v3204_v50  ;;  %v3207_v43 = vadd.f32 %v5133_v38, %v2820_v16  ;;  %v3522_v44 = vpop.f32.mrf.mxu0  ;;  %v3676_v19 = vsel %vm249_vm0, %v6889_v55, 0.0  ;;  %v2438_v24 = vadd.f32 %v6658_v6, %v7360_v3  ;;  %v7361_v50 = vld [vmem:[#allocation37_spill] sm:$0xff]  ;;  %v7362_v38 = vld [vmem:[#allocation27_spill] sm:$0xff] }
 0x1eb   : > { %v3673_v59 = vadd.f32 %v3672_v33, %v3671_v9  ;;  %v3135_v48 = vpop.f32.mrf.mxu1  ;;  %v2824_v0 = vadd.f32 %v7361_v50, %v2436_v20 }
 0x1ec   : > { %3623 = vst.msk [vmem:[%s6688_s6 + $0xa0] sm:$0xff] %vm249_vm0, %v6899_v32  ;;  %v3674_v7 = vsel %vm249_vm0, %v6899_v32, 0.0  ;;  %v6909_v23 = vadd.f32 %v5183_v26, %v3207_v43  ;;  %v3206_v35 = vadd.f32 %v3135_v48, %v2819_v18  ;;  %v5186_v45 = vpop.f32.mrf.mxu0  ;;  %v7363_v26 = vld [vmem:[#allocation41_spill] sm:$0xff]  ;;  %v7364_v43 = vld [vmem:[#allocation39_spill] sm:$0xff] }
 0x1ed   : > { %v3675_v31 = vadd.f32 %v3674_v7, %v3673_v59  ;;  %v5136_v30 = vpop.f32.mrf.mxu1  ;;  %v2437_v12 = vadd.f32 %v7363_v26, %v7362_v38  ;;  %v2823_v15 = vadd.f32 %v7364_v43, %v2435_v42 }
 0x1ee   : > { %3626 = vst.msk [vmem:[%s6688_s6 + $0xb8] sm:$0xff] %vm249_vm0, %v6909_v23  ;;  %v6919_v40 = vadd.f32 %v3522_v44, %v3206_v35  ;;  %v3209_v41 = vadd.f32 %v5136_v30, %v2822_v27  ;;  %v3532_v34 = vpop.f32.mrf.mxu0  ;;  %v3680_v27 = vsel %vm249_vm0, %v6909_v23, 0.0  ;;  %v7365_v44 = vld [vmem:[#allocation40_spill] sm:$0xff] }
 0x1ef   : > { %v3677_v4 = vadd.f32 %v3676_v19, %v3675_v31  ;;  %v3145_v16 = vpop.f32.mrf.mxu1  ;;  %v2826_v57 = vadd.f32 %v7365_v44, %v2438_v24  ;;  %v7366_v35 = vld [vmem:[#allocation28_spill] sm:$0xff] }
 0x1f0   : > { %3625 = vst.msk [vmem:[%s6688_s6 + $0xb0] sm:$0xff] %vm249_vm0, %v6919_v40  ;;  %v3678_v36 = vsel %vm249_vm0, %v6919_v40, 0.0  ;;  %v6929_v8 = vadd.f32 %v5186_v45, %v3209_v41  ;;  %v3208_v9 = vadd.f32 %v3145_v16, %v2821_v21  ;;  %v5189_v33 = vpop.f32.mrf.mxu0  ;;  %v2440_v60 = vadd.f32 %v6667_v58, %v7366_v35  ;;  %v7367_v45 = vld [vmem:[#allocation42_spill] sm:$0xff]  ;;  %v7368_v41 = vld [vmem:[#allocation29_spill] sm:$0xff] }
 0x1f1   : > { %v3679_v18 = vadd.f32 %v3678_v36, %v3677_v4  ;;  %v5139_v6 = vpop.f32.mrf.mxu1  ;;  %v2825_v46 = vadd.f32 %v7367_v45, %v2437_v12  ;;  %v2439_v3 = vadd.f32 %v6672_v62, %v7368_v41 }
 0x1f2   : > { %3628 = vst.msk [vmem:[%s6688_s6 + $0xc8] sm:$0xff] %vm249_vm0, %v6929_v8  ;;  %v6939_v59 = vadd.f32 %v3532_v34, %v3208_v9  ;;  %v3211_v48 = vadd.f32 %v5139_v6, %v2824_v0  ;;  %v3542_v7 = vpop.f32.mrf.mxu0  ;;  %v3684_v58 = vsel %vm249_vm0, %v6929_v8, 0.0  ;;  %v7369_v0 = vld [vmem:[#allocation43_spill] sm:$0xff] }
 0x1f3   : > { %v3681_v11 = vadd.f32 %v3680_v27, %v3679_v18  ;;  %v3155_v20 = vpop.f32.mrf.mxu1  ;;  %v2828_v36 = vadd.f32 %v7369_v0, %v2440_v60  ;;  %v2827_v6 = vadd.f32 %v6674_v47, %v2439_v3 }
 0x1f4   : > { %3627 = vst.msk [vmem:[%s6688_s6 + $0xc0] sm:$0xff] %vm249_vm0, %v6939_v59  ;;  %v3682_v21 = vsel %vm249_vm0, %v6939_v59, 0.0  ;;  %v6949_v31 = vadd.f32 %v5189_v33, %v3211_v48  ;;  %v3210_v30 = vadd.f32 %v3155_v20, %v2823_v15  ;;  %v5192_v19 = vpop.f32.mrf.mxu0 }
 0x1f5   : > { %v3683_v22 = vadd.f32 %v3682_v21, %v3681_v11  ;;  %v5142_v42 = vpop.f32.mrf.mxu1 }
 0x1f6   : > { %3630 = vst.msk [vmem:[%s6688_s6 + $0xd8] sm:$0xff] %vm249_vm0, %v6949_v31  ;;  %v6959_v24 = vadd.f32 %v3542_v7, %v3210_v30  ;;  %v3213_v4 = vadd.f32 %v5142_v42, %v2826_v57  ;;  %v3552_v50 = vpop.f32.mrf.mxu0  ;;  %v3688_v33 = vsel %vm249_vm0, %v6949_v31, 0.0 }
 0x1f7   : > { %v3685_v16 = vadd.f32 %v3684_v58, %v3683_v22  ;;  %v3165_v34 = vpop.f32.mrf.mxu1 }
 0x1f8   : > { %3629 = vst.msk [vmem:[%s6688_s6 + $0xd0] sm:$0xff] %vm249_vm0, %v6959_v24  ;;  %v3686_v62 = vsel %vm249_vm0, %v6959_v24, 0.0  ;;  %v6967_v9 = vadd.f32 %v5192_v19, %v3213_v4  ;;  %v3212_v38 = vadd.f32 %v3165_v34, %v2825_v46  ;;  %v5195_v18 = vpop.f32.mrf.mxu0 }
 0x1f9   : > { %v3687_v26 = vadd.f32 %v3686_v62, %v3685_v16  ;;  %v5145_v12 = vpop.f32.mrf.mxu1 }
 0x1fa   : > { %3632 = vst.msk [vmem:[%s6688_s6 + $0xe8] sm:$0xff] %vm249_vm0, %v6967_v9  ;;  %v6975_v43 = vadd.f32 %v3552_v50, %v3212_v38  ;;  %v3215_v15 = vadd.f32 %v5145_v12, %v2828_v36  ;;  %v3562_v20 = vpop.f32.mrf.mxu0  ;;  %v3692_v7 = vsel %vm249_vm0, %v6967_v9, 0.0 }
 0x1fb   : > { %v3689_v27 = vadd.f32 %v3688_v33, %v3687_v26  ;;  %v3175_v48 = vpop.f32.mrf.mxu1 }
 0x1fc   : > { %3631 = vst.msk [vmem:[%s6688_s6 + $0xe0] sm:$0xff] %vm249_vm0, %v6975_v43  ;;  %v3690_v44 = vsel %vm249_vm0, %v6975_v43, 0.0  ;;  %v6982_v57 = vadd.f32 %v5195_v18, %v3215_v15  ;;  %v3214_v47 = vadd.f32 %v3175_v48, %v2827_v6 }
 0x1fd   : > { %v3691_v11 = vadd.f32 %v3690_v44, %v3689_v27 }
 0x1fe   : > { %3634 = vst.msk [vmem:[%s6688_s6 + $0xf8] sm:$0xff] %vm249_vm0, %v6982_v57  ;;  %v6989_v35 = vadd.f32 %v3562_v20, %v3214_v47  ;;  %v3696_v45 = vsel %vm249_vm0, %v6982_v57, 0.0 }
 0x1ff   : > { %v3693_v60 = vadd.f32 %v3692_v7, %v3691_v11 }
 0x200   : > { %3633 = vst.msk [vmem:[%s6688_s6 + $0xf0] sm:$0xff] %vm249_vm0, %v6989_v35  ;;  %v3694_v21 = vsel %vm249_vm0, %v6989_v35, 0.0 }
 0x201   : > { %v3695_v30 = vadd.f32 %v3694_v21, %v3693_v60 }
 0x203   : > { %v3697_v46 = vadd.f32 %v3696_v45, %v3695_v30 }
 0x205   : > { %v3698_v22 = vrot.slane %v3697_v46, 4 }
 0x207   : > { %v3699_v42 = vadd.f32 %v3698_v22, %v3697_v46 }
 0x209   : > { %v3700_v19 = vrot.slane %v3699_v42, 2 }
 0x20b   : > { %v3701_v41 = vadd.f32 %v3700_v19, %v3699_v42 }
 0x20d   : > { %v3702_v3 = vrot.slane %v3701_v41, 1 }
 0x20f   : > { %v6998_v58 = vadd.f32 %v3702_v3, %v3701_v41 }
 0x211   : > { %v7001_v4 = vmul.f32 0.00390625, %v6998_v58 }
 0x213   : > { %v3705_v16 = vsub.f32 %v6699_v53, %v7001_v4  ;;  %v3706_v34 = vsub.f32 %v6691_v10, %v7001_v4  ;;  %v3707_v50 = vsub.f32 %v6719_v63, %v7001_v4  ;;  %v3708_v0 = vsub.f32 %v6709_v39, %v7001_v4 }
 0x214   : > { %v3709_v38 = vsub.f32 %v6739_v28, %v7001_v4  ;;  %v3710_v12 = vsub.f32 %v6729_v61, %v7001_v4  ;;  %v3711_v63 = vsub.f32 %v6759_v13, %v7001_v4  ;;  %v3712_v28 = vsub.f32 %v6749_v37, %v7001_v4 }
 0x215   : > { %v3737_v36 = vmul.f32 %v3705_v16, %v3705_v16  ;;  %v3738_v62 = vmul.f32 %v3706_v34, %v3706_v34  ;;  %v3739_v26 = vmul.f32 %v3707_v50, %v3707_v50  ;;  %v3740_v18 = vmul.f32 %v3708_v0, %v3708_v0 }
 0x216   : > { %v3741_v33 = vmul.f32 %v3709_v38, %v3709_v38  ;;  %v3742_v27 = vmul.f32 %v3710_v12, %v3710_v12  ;;  %v3713_v44 = vsub.f32 %v6779_v49, %v7001_v4  ;;  %v3743_v47 = vmul.f32 %v3711_v63, %v3711_v63 }
 0x217   : > { %v3769_v53 = vsel %vm249_vm0, %v3737_v36, 0.0  ;;  %v3770_v10 = vsel %vm249_vm0, %v3738_v62, 0.0  ;;  %v3772_v39 = vsel %vm249_vm0, %v3739_v26, 0.0  ;;  %v3774_v48 = vsel %vm249_vm0, %v3740_v18, 0.0 }
 0x218   : > { %v3771_v6 = vadd.f32 %v3770_v10, %v3769_v53  ;;  %v3776_v11 = vsel %vm249_vm0, %v3741_v33, 0.0  ;;  %v3714_v13 = vsub.f32 %v6769_v25, %v7001_v4  ;;  %v3744_v7 = vmul.f32 %v3712_v28, %v3712_v28 }
 0x219   : > { %v3778_v60 = vsel %vm249_vm0, %v3742_v27, 0.0  ;;  %v3715_v37 = vsub.f32 %v6799_v2, %v7001_v4  ;;  %v3745_v30 = vmul.f32 %v3713_v44, %v3713_v44  ;;  %v3780_v45 = vsel %vm249_vm0, %v3743_v47, 0.0 }
 0x21a   : > { %v3773_v15 = vadd.f32 %v3772_v39, %v3771_v6  ;;  %v3716_v49 = vsub.f32 %v6789_v29, %v7001_v4  ;;  %v3746_v22 = vmul.f32 %v3714_v13, %v3714_v13  ;;  %v3782_v42 = vsel %vm249_vm0, %v3744_v7, 0.0 }
 0x21b   : > { %v3717_v25 = vsub.f32 %v6819_v14, %v7001_v4  ;;  %v3747_v41 = vmul.f32 %v3715_v37, %v3715_v37  ;;  %v3784_v3 = vsel %vm249_vm0, %v3745_v30, 0.0  ;;  %v3718_v2 = vsub.f32 %v6809_v5, %v7001_v4 }
 0x21c   : > { %v3775_v61 = vadd.f32 %v3774_v48, %v3773_v15  ;;  %v3748_v34 = vmul.f32 %v3716_v49, %v3716_v49  ;;  %v3786_v50 = vsel %vm249_vm0, %v3746_v22, 0.0  ;;  %v3719_v29 = vsub.f32 %v6839_v17, %v7001_v4 }
 0x21d   : > { %v3749_v36 = vmul.f32 %v3717_v25, %v3717_v25  ;;  %v3788_v62 = vsel %vm249_vm0, %v3747_v41, 0.0  ;;  %v3720_v14 = vsub.f32 %v6829_v51, %v7001_v4  ;;  %v3750_v26 = vmul.f32 %v3718_v2, %v3718_v2 }
 0x21e   : > { %v3777_v20 = vadd.f32 %v3776_v11, %v3775_v61  ;;  %v3790_v12 = vsel %vm249_vm0, %v3748_v34, 0.0  ;;  %v3721_v5 = vsub.f32 %v6859_v54, %v7001_v4  ;;  %v3751_v53 = vmul.f32 %v3719_v29, %v3719_v29 }
 0x21f   : > { %v3792_v10 = vsel %vm249_vm0, %v3749_v36, 0.0  ;;  %v3722_v17 = vsub.f32 %v6849_v1, %v7001_v4  ;;  %v3752_v63 = vmul.f32 %v3720_v14, %v3720_v14  ;;  %v3794_v33 = vsel %vm249_vm0, %v3750_v26, 0.0 }
 0x220   : > { %v3779_v21 = vadd.f32 %v3778_v60, %v3777_v20  ;;  %v3723_v51 = vsub.f32 %v6879_v52, %v7001_v4  ;;  %v3753_v15 = vmul.f32 %v3721_v5, %v3721_v5  ;;  %v3796_v28 = vsel %vm249_vm0, %v3751_v53, 0.0 }
 0x221   : > { %v3724_v54 = vsub.f32 %v6869_v56, %v7001_v4  ;;  %v3754_v48 = vmul.f32 %v3722_v17, %v3722_v17  ;;  %v3798_v61 = vsel %vm249_vm0, %v3752_v63, 0.0  ;;  %v3725_v1 = vsub.f32 %v6899_v32, %v7001_v4 }
 0x222   : > { %v3781_v46 = vadd.f32 %v3780_v45, %v3779_v21  ;;  %v3755_v47 = vmul.f32 %v3723_v51, %v3723_v51  ;;  %v3800_v11 = vsel %vm249_vm0, %v3753_v15, 0.0  ;;  %v3726_v52 = vsub.f32 %v6889_v55, %v7001_v4 }
 0x223   : > { %v3756_v13 = vmul.f32 %v3724_v54, %v3724_v54  ;;  %v3802_v7 = vsel %vm249_vm0, %v3754_v48, 0.0  ;;  %v3727_v56 = vsub.f32 %v6919_v40, %v7001_v4  ;;  %v3757_v21 = vmul.f32 %v3725_v1, %v3725_v1 }
 0x224   : > { %v3783_v19 = vadd.f32 %v3782_v42, %v3781_v46  ;;  %v3804_v37 = vsel %vm249_vm0, %v3755_v47, 0.0  ;;  %v3728_v32 = vsub.f32 %v6909_v23, %v7001_v4  ;;  %v3758_v45 = vmul.f32 %v3726_v52, %v3726_v52 }
 0x225   : > { %v3806_v46 = vsel %vm249_vm0, %v3756_v13, 0.0  ;;  %v3729_v55 = vsub.f32 %v6939_v59, %v7001_v4  ;;  %v3759_v22 = vmul.f32 %v3727_v56, %v3727_v56  ;;  %v3808_v42 = vsel %vm249_vm0, %v3757_v21, 0.0 }
 0x226   : > { %v3785_v16 = vadd.f32 %v3784_v3, %v3783_v19  ;;  %v3730_v40 = vsub.f32 %v6929_v8, %v7001_v4  ;;  %v3760_v25 = vmul.f32 %v3728_v32, %v3728_v32  ;;  %v3810_v41 = vsel %vm249_vm0, %v3758_v45, 0.0 }
 0x227   : > { %v3731_v23 = vsub.f32 %v6959_v24, %v7001_v4  ;;  %v3812_v2 = vsel %vm249_vm0, %v3759_v22, 0.0  ;;  %v3732_v59 = vsub.f32 %v6949_v31, %v7001_v4  ;;  %v3733_v8 = vsub.f32 %v6975_v43, %v7001_v4 }
 0x228   : > { %v3787_v0 = vadd.f32 %v3786_v50, %v3785_v16  ;;  %v3761_v16 = vmul.f32 %v3729_v55, %v3729_v55  ;;  %v3762_v50 = vmul.f32 %v3730_v40, %v3730_v40  ;;  %v3734_v24 = vsub.f32 %v6967_v9, %v7001_v4 }
 0x229   : > { %v3763_v36 = vmul.f32 %v3731_v23, %v3731_v23  ;;  %v3764_v14 = vmul.f32 %v3732_v59, %v3732_v59  ;;  %v3735_v31 = vsub.f32 %v6989_v35, %v7001_v4  ;;  %v3736_v43 = vsub.f32 %v6982_v57, %v7001_v4 }
 0x22a   : > { %v3789_v38 = vadd.f32 %v3788_v62, %v3787_v0  ;;  %v3814_v0 = vsel %vm249_vm0, %v3760_v25, 0.0  ;;  %v3816_v62 = vsel %vm249_vm0, %v3761_v16, 0.0  ;;  %v3818_v26 = vsel %vm249_vm0, %v3762_v50, 0.0 }
 0x22b   : > { %v3820_v5 = vsel %vm249_vm0, %v3763_v36, 0.0  ;;  %v3767_v9 = vmul.f32 %v3735_v31, %v3735_v31 }
 0x22c   : > { %v3791_v18 = vadd.f32 %v3790_v12, %v3789_v38 }
 0x22d   : > { %v3828_v15 = vsel %vm249_vm0, %v3767_v9, 0.0 }
 0x22e   : > { %v3793_v6 = vadd.f32 %v3792_v10, %v3791_v18  ;;  %v3765_v18 = vmul.f32 %v3733_v8, %v3733_v8  ;;  %v3766_v10 = vmul.f32 %v3734_v24, %v3734_v24 }
 0x230   : > { %v3795_v39 = vadd.f32 %v3794_v33, %v3793_v6  ;;  %v3822_v6 = vsel %vm249_vm0, %v3764_v14, 0.0  ;;  %v3824_v63 = vsel %vm249_vm0, %v3765_v18, 0.0  ;;  %v3826_v35 = vsel %vm249_vm0, %v3766_v10, 0.0 }
 0x232   : > { %v3797_v27 = vadd.f32 %v3796_v28, %v3795_v39  ;;  %v3768_v39 = vmul.f32 %v3736_v43, %v3736_v43 }
 0x234   : > { %v3799_v44 = vadd.f32 %v3798_v61, %v3797_v27  ;;  %v3830_v27 = vsel %vm249_vm0, %v3768_v39, 0.0 }
 0x236   : > { %v3801_v20 = vadd.f32 %v3800_v11, %v3799_v44 }
 0x238   : > { %v3803_v60 = vadd.f32 %v3802_v7, %v3801_v20 }
 0x23a   : > { %v3805_v30 = vadd.f32 %v3804_v37, %v3803_v60 }
 0x23c   : > { %v3807_v49 = vadd.f32 %v3806_v46, %v3805_v30 }
 0x23e   : > { %v3809_v19 = vadd.f32 %v3808_v42, %v3807_v49 }
 0x240   : > { %v3811_v3 = vadd.f32 %v3810_v41, %v3809_v19 }
 0x242   : > { %v3813_v34 = vadd.f32 %v3812_v2, %v3811_v3 }
 0x244   : > { %v3815_v29 = vadd.f32 %v3814_v0, %v3813_v34 }
 0x246   : > { %v3817_v38 = vadd.f32 %v3816_v62, %v3815_v29 }
 0x248   : > { %v3819_v12 = vadd.f32 %v3818_v26, %v3817_v38 }
 0x24a   : > { %v3821_v53 = vadd.f32 %v3820_v5, %v3819_v12 }
 0x24c   : > { %v3823_v17 = vadd.f32 %v3822_v6, %v3821_v53 }
 0x24e   : > { %v3825_v33 = vadd.f32 %v3824_v63, %v3823_v17 }
 0x250   : > { %v3827_v51 = vadd.f32 %v3826_v35, %v3825_v33 }
 0x252   : > { %v3829_v28 = vadd.f32 %v3828_v15, %v3827_v51 }
 0x254   : > { %v3831_v54 = vadd.f32 %v3830_v27, %v3829_v28 }
 0x256   : > { %v3832_v57 = vrot.slane %v3831_v54, 4 }
 0x258   : > { %v3833_v4 = vadd.f32 %v3832_v57, %v3831_v54 }
 0x25a   : > { %v3834_v48 = vrot.slane %v3833_v4, 2 }
 0x25c   : > { %v3835_v61 = vadd.f32 %v3834_v48, %v3833_v4 }
 0x25e   : > { %v3836_v44 = vrot.slane %v3835_v61, 1 }
 0x260   : > { %v3837_v1 = vadd.f32 %v3836_v44, %v3835_v61 }
 0x262   : > { %v3839_v47 = vsel %vm3838_vm1, %v6998_v58, %v3837_v1 }
 0x263   : > { %3841 = vst.msk [vmem:[%s171_s9] sm:$0x3] %vm3840_vm2, %v3839_v47 }
 0x264   : > { %5251 = shalt.err (!%p5248_p3)
}
 0x265   : > { %s5252_s27 = scalar_lea.hbm %s7104_s19, 32  ;;  %s5256_s4 = scalar_lea.hbm %s7143_s3, 64 }
 0x266   : > { %p5253_p4 = scmp.ne.s32.totalorder %s7104_s19, %s5252_s27  ;;  %p5257_p9 = scmp.lt.s32.totalorder %s7104_s19, %s7143_s3 }
 0x267   : > { %p5258_p10 = scmp.lt.s32.totalorder %s5256_s4, %s5252_s27 }
 0x268   : > { %p5254_p7 = pnand %p5253_p4, %p5359_p5 }
 0x269   : > { %p5259_p11 = por %p5258_p10, %p5257_p9 }
 0x26a   : > { %p5255_p8 = pneg %p5254_p7 }
 0x26c   : > { %p5260_p12 = pnand %p5259_p11, %p5255_p8 }
 0x26e   : > { %5263 = shalt.err (!%p5260_p12)
}
 0x26f   : > { %5199 = dma.vmem_to_hbm [thread:$0]  (%p5359_p5), %s3865_s10, 32, %s7104_s19, %s3848_s20  }
 0x270 PF: > { %p5205_p13 = scmp.ge.s32.totalorder %s5298_s15, 2  ;;  %s3884_s30 = sand.u32 1, %s5286_s12  }
 0x271   : > { %s3885_s7 = scalar_lea.sflag [#allocation3], %s3884_s30 }
 0x272   : > { %p5202_p0 = pnand %p5205_p13, %p5363_p6 }
 0x274   : > { %p5203_p1 = pneg %p5202_p0 }
 0x276   : > { %5281 = dma.done.wait (%p5203_p1), %s3885_s7, 32  }
 0x277   : > { %5283 = vsyncadd (%p5203_p1), %s3885_s7, 4294967264  ;;  %p14_p2 = scmp.ge.s32.totalorder %s5346_s18, 4   ;;  %s7370_s12 = smov %s5290_s13 }
 0x278   : > { %s7371_s13 = smov %s5294_s14  ;;  %s7372_s14 = smov %s5357_s21 }
 0x279   : > { %s7373_s15 = smov %s5346_s18  ;;  %16 = sbr.rel (!%p14_p2) target bundleno = 3 (0x3), region = 85 }
 0x27e   :  { %3890 = vsyncpa [#allocation3], 1 }
 0x27f   :  { %3892 = vsyncpa [#allocation3 + $0x1], 1 }

</bundles_post_ra>
